<compile_context>
chip_gen: v5e
topology: v5e:2x2
jax: 0.10.0
libtpu: 0.0.40
codegen_flags: <defaults>
</compile_context>

<pallas_src>
import functools
import math

import jax
import jax.numpy as jnp
from jax.experimental import pallas as pl
from jax.experimental.pallas import tpu as pltpu


# ----------------------------- kernels --------------------------------------


def _quantize_kernel(x_ref, vals_ref, q_ref, idx_ref):
    """General nearest-codebook quantization (arbitrary / learned codebook).

    x_ref:    (R, C) f32   -- lane-packed latent values
    vals_ref: (V, C) f32   -- lane-packed codebook (entry v is a row)
    q_ref:    (R, C) f32   -- quantized values (output)
    idx_ref:  (R, C) i8/i32 -- argmin indices (output)
    """
    x = x_ref[...]
    num_values = vals_ref.shape[0]

    # Seed with codebook entry 0 (always finite). (1, C) rows broadcast along
    # the sublane axis inside the VALU ops -- no materialized (R, C) temp.
    row0 = vals_ref[0:1, :]                            # (1, C)
    best_d = jnp.abs(x - row0)                         # (R, C)
    best_q = jnp.broadcast_to(row0, x.shape)
    best_i = jnp.zeros(x.shape, dtype=jnp.int32)

    # V is small & static: unrolled VPU loop. Strict '<' keeps the FIRST
    # minimum (matches torch.argmin tie-breaking); +inf-padded entries of a
    # ragged codebook have d == inf and are never selected.
    for v in range(1, num_values):
        row = vals_ref[v:v + 1, :]                     # (1, C) broadcast row
        d = jnp.abs(x - row)
        m = d < best_d
        best_d = jnp.where(m, d, best_d)
        best_q = jnp.where(m, row, best_q)
        best_i = jnp.where(m, jnp.int32(v), best_i)

    q_ref[...] = best_q
    idx_ref[...] = best_i.astype(idx_ref.dtype)


def _quantize_sorted_kernel(x_ref, base_ref, mids_ref, deltas_ref, q_ref, idx_ref):
    """Sorted-codebook path (ascending rows): midpoint formulation.

    Per codebook entry: {cmp x > mid_v; idx += mask; q += where(mask, delta_v, 0)}
    -> 4 VALU ops/entry vs 6 in the general loop; no best_d carry, no abs.
    Strict '>' at exact midpoints picks the lower index (torch first-min).
    +inf-padded ragged entries give mid == inf -> mask always False -> ignored.
    """
    x = x_ref[...]
    num_mids = mids_ref.shape[0]

    q = jnp.broadcast_to(base_ref[0:1, :], x.shape)    # codebook entry 0
    idx = jnp.zeros(x.shape, dtype=jnp.int32)

    for v in range(num_mids):
        m = x > mids_ref[v:v + 1, :]
        idx = idx + m.astype(jnp.int32)
        q = q + jnp.where(m, deltas_ref[v:v + 1, :], 0.0)

    q_ref[...] = q
    idx_ref[...] = idx.astype(idx_ref.dtype)


def _quantize_uniform_kernel(x_ref, q_ref, idx_ref, *, num_values):
    """Fast path: every latent's codebook is exactly linspace(-0.5, 0.5, V).

    idx = clamp(round((x + 0.5) * (V-1)), 0, V-1); q = idx/(V-1) - 0.5.
    ~6 VPU ops/elem; at exact midpoints rounding is half-to-even rather than
    torch's first-min (measure-zero difference for continuous inputs).
    No codebook operand -> one fewer resident VMEM buffer / DMA.
    """
    n = float(num_values - 1)
    x = x_ref[...]
    f = jnp.clip(jnp.round((x + 0.5) * n), 0.0, n)
    q_ref[...] = f * (1.0 / n) - 0.5
    idx_ref[...] = f.astype(jnp.int32).astype(idx_ref.dtype)


# --------------------------- packing + pallas_call ---------------------------


def _round_up(a, b):
    return -(-a // b) * b


def _quantize_impl(x, svpl, codebook_mode, lane_target, row_tile_target):
    """Lane-pack, tile, and run the quantization kernel. Returns (q, idx)."""
    B, L = x.shape
    V = svpl.shape[1]
    if codebook_mode not in ("general", "sorted", "uniform"):
        raise ValueError(f"unknown codebook_mode: {codebook_mode}")
    if V < 2:
        codebook_mode = "general"       # degenerate codebook: trivial loop

    xf = x.astype(jnp.float32)
    vals_t = svpl.T.astype(jnp.float32)                # (V, L)

    idx_dtype = jnp.int8 if V <= 127 else jnp.int32
    idx_bytes = 1 if idx_dtype == jnp.int8 else 4
    ROW_GRAN = 32                                       # int8 (32,128) min tile

    # ---- lane packing: fold r batch rows into the lane axis so the packed
    #      width is a multiple of 128 (dense, unmasked stores). Grow toward
    #      lane_target but never fold more rows than the batch provides.
    r = 128 // math.gcd(L, 128)
    while r * L < lane_target and r * 2 <= max(B, 1):
        r *= 2
    lanes = r * L

    rows_needed = -(-B // r)
    rows0 = _round_up(rows_needed, ROW_GRAN)

    # ---- row tiling: per-step live data (x + q + idx) ~9 B/elem; clamp the
    #      tile to ~12 MiB per step so the double-buffered footprint (~24 MiB)
    #      stays inside the scoped-VMEM budget on every generation (v7x: 64 MiB
    #      physical).
    bytes_per_elem = 4 + 4 + idx_bytes
    step_budget = 12 * 1024 * 1024
    max_rows_by_vmem = max(
        ROW_GRAN, (step_budget // (lanes * bytes_per_elem)) // ROW_GRAN * ROW_GRAN)
    tile_r = min(_round_up(row_tile_target, ROW_GRAN), max_rows_by_vmem, rows0)
    # Give megacore (v7x: 2 TCs) at least two grid steps when possible without
    # introducing extra row padding.
    if rows0 // tile_r < 2 and rows0 >= 2 * ROW_GRAN and (rows0 // 2) % ROW_GRAN == 0:
        tile_r = rows0 // 2
    rows = _round_up(rows0, tile_r)
    b_pad = rows * r

    if b_pad != B:
        xf = jnp.zeros((b_pad, L), jnp.float32).at[:B].set(xf)
    xp = xf.reshape(rows, lanes)                        # (rows, lanes)

    x_spec = pl.BlockSpec((tile_r, lanes), lambda i: (i, 0))
    out_specs = [pl.BlockSpec((tile_r, lanes), lambda i: (i, 0)),
                 pl.BlockSpec((tile_r, lanes), lambda i: (i, 0))]

    if codebook_mode == "uniform":
        kernel = functools.partial(_quantize_uniform_kernel, num_values=V)
        operands = (xp,)
        in_specs = [x_spec]
        cb_bytes = 0
    elif codebook_mode == "sorted":
        vals_p = jnp.tile(vals_t, (1, r))               # (V, lanes), small
        base_p = vals_p[:1]                             # (1, lanes)
        mids_p = 0.5 * (vals_p[:-1] + vals_p[1:])       # (V-1, lanes)
        deltas_p = vals_p[1:] - vals_p[:-1]             # (V-1, lanes)
        kernel = _quantize_sorted_kernel
        operands = (xp, base_p, mids_p, deltas_p)
        in_specs = [x_spec,
                    pl.BlockSpec((1, lanes), lambda i: (0, 0)),
                    pl.BlockSpec((V - 1, lanes), lambda i: (0, 0)),
                    pl.BlockSpec((V - 1, lanes), lambda i: (0, 0))]
        cb_bytes = (2 * V - 1) * lanes * 4
    else:  # general
        vals_p = jnp.tile(vals_t, (1, r))               # (V, lanes), small
        kernel = _quantize_kernel
        operands = (xp, vals_p)
        in_specs = [x_spec, pl.BlockSpec((V, lanes), lambda i: (0, 0))]
        cb_bytes = V * lanes * 4

    step_bytes = tile_r * lanes * bytes_per_elem + cb_bytes
    vmem_limit = int(max(32 * 1024 * 1024, min(56 * 1024 * 1024, 3 * step_bytes)))

    grid = (rows // tile_r,)
    q_p, idx_p = pl.pallas_call(
        kernel,
        out_shape=(
            jax.ShapeDtypeStruct((rows, lanes), jnp.float32),
            jax.ShapeDtypeStruct((rows, lanes), idx_dtype),
        ),
        grid_spec=pltpu.PrefetchScalarGridSpec(
            num_scalar_prefetch=0,
            grid=grid,
            in_specs=in_specs,
            out_specs=out_specs,
        ),
        compiler_params=pltpu.CompilerParams(
            # single parallel grid axis: steps shard across v7x's two TCs;
            # neutral on single-TC v5e/v6e.
            dimension_semantics=("parallel",),
            vmem_limit_bytes=vmem_limit),
    )(*operands)

    q = q_p.reshape(b_pad, L)
    idx = idx_p.reshape(b_pad, L)
    if b_pad != B:
        q = q[:B]
        idx = idx[:B]
    return q, idx


# ------------------------- gradients (custom_vjp) ----------------------------


@functools.partial(jax.custom_vjp, nondiff_argnums=(2, 3, 4))
def _quantize(x, svpl, codebook_mode, lane_target, row_tile_target):
    return _quantize_impl(x, svpl, codebook_mode, lane_target, row_tile_target)


def _quantize_fwd(x, svpl, codebook_mode, lane_target, row_tile_target):
    q, idx = _quantize_impl(x, svpl, codebook_mode, lane_target, row_tile_target)
    return (q, idx), (idx, svpl)


def _quantize_bwd(codebook_mode, lane_target, row_tile_target, res, cts):
    # z_quantized cotangent flows to the selected codebook entries (scatter-add),
    # mirroring torch's values[index] backward. x gets zero through this path
    # (argmin has zero gradient), matching torch.
    gq, _ = cts                                # idx cotangent is float0 -> ignore
    idx, svpl = res
    idx32 = idx.astype(jnp.int32)
    lat = jax.lax.broadcasted_iota(jnp.int32, idx32.shape, 1)
    gsvpl = jnp.zeros_like(svpl).at[lat, idx32].add(gq.astype(svpl.dtype))
    gx = jnp.zeros(gq.shape, gq.dtype)
    return gx, gsvpl


_quantize.defvjp(_quantize_fwd, _quantize_bwd)


@jax.custom_vjp
def _straight_through(x, q):
    # Forward-identical to q (so no extra "x + sg(q - x)" HBM pass); backward
    # routes the z_hat cotangent to x only -- exactly torch's x + (q - x).detach().
    return q


def _st_fwd(x, q):
    return q, None


def _st_bwd(_, g):
    return (g, jnp.zeros_like(g))


_straight_through.defvjp(_st_fwd, _st_bwd)


# ------------------------------- public API ----------------------------------


@functools.partial(
    jax.jit, static_argnames=("codebook_mode", "lane_target", "row_tile_target"))
def quantized_latent_forward(x, svpl, *, codebook_mode="general",
                             lane_target=1024, row_tile_target=512):
    """Pallas-backed forward of QuantizedLatent.

    x:    (B, L) float32 latents.
    svpl: (L, V) float32 codebook (rows = values per latent).
    codebook_mode: "general" (any codebook), "sorted" (rows ascending, faster),
                   "uniform" (rows are exactly linspace(-0.5, 0.5, V), fastest).
    Returns dict(z_continuous, z_quantized, z_hat, z_indices).
    """
    x32 = x.astype(jnp.float32)
    svpl32 = svpl.astype(jnp.float32)
    q, idx = _quantize(x32, svpl32, codebook_mode, lane_target, row_tile_target)
    z_hat = _straight_through(x32, q)          # == q in forward, STE in backward
    return {
        "z_continuous": x32,
        "z_quantized": q,
        "z_hat": z_hat,
        "z_indices": idx,   # int8 for V<=127 (torch uses int64; values identical)
    }


def _reference_forward(x, svpl):
    # Pure-JAX reference mirroring the PyTorch module.
    d = jnp.abs(x[:, :, None] - svpl[None, :, :])            # (B, L, V)
    idx = jnp.argmin(d, axis=-1)                             # (B, L), first min
    q = jnp.take_along_axis(svpl[None, :, :],
                            idx[:, :, None], axis=-1)[..., 0]
    return q, idx.astype(jnp.int32)


if __name__ == "__main__":
    # Module config (synthetic, deterministic): num_latents=32, V=8 values/latent.
    num_latents = 32
    num_values_per_latent = 8
    batch = 16

    # svpl init exactly as in __init__: linspace(-0.5, 0.5, V) per latent.
    row = jnp.linspace(-0.5, 0.5, num_values_per_latent, dtype=jnp.float32)
    svpl = jnp.tile(row[None, :], (num_latents, 1))          # (L, V)

    key = jax.random.PRNGKey(0)
    x = 0.6 * jax.random.normal(key, (batch, num_latents), dtype=jnp.float32)

    q_ref, idx_ref = _reference_forward(x, svpl)

    # ---- general (arbitrary / learned codebook) kernel ----
    outs = quantized_latent_forward(x, svpl, codebook_mode="general")
    jax.block_until_ready(outs)
    assert jnp.allclose(outs["z_quantized"], q_ref, atol=1e-6)
    assert jnp.allclose(outs["z_hat"], q_ref, atol=1e-6)
    assert jnp.array_equal(outs["z_indices"].astype(jnp.int32), idx_ref)
    assert jnp.allclose(outs["z_continuous"], x)

    # ---- sorted-codebook (midpoint) kernel: rows ascending, true at init ----
    outs_s = quantized_latent_forward(x, svpl, codebook_mode="sorted")
    jax.block_until_ready(outs_s)
    assert jnp.allclose(outs_s["z_quantized"], q_ref, atol=1e-6)
    assert jnp.array_equal(outs_s["z_indices"].astype(jnp.int32), idx_ref)

    # ---- analytic fast path (codebook exactly linspace(-0.5, 0.5, V)) ----
    outs_u = quantized_latent_forward(x, svpl, codebook_mode="uniform")
    jax.block_until_ready(outs_u)
    n = num_values_per_latent - 1
    idx_formula = jnp.clip(jnp.round((x + 0.5) * n), 0, n).astype(jnp.int32)
    assert jnp.array_equal(outs_u["z_indices"].astype(jnp.int32), idx_formula)
    assert jnp.mean(jnp.abs(outs_u["z_quantized"] - q_ref)) < 1e-3

    # ---- straight-through / codebook gradients (custom_vjp paths) ----
    g_x = jax.grad(lambda xx: quantized_latent_forward(xx, svpl)["z_hat"].sum())(x)
    assert jnp.allclose(g_x, 1.0)
    g_v = jax.grad(
        lambda vv: quantized_latent_forward(x, vv)["z_quantized"].sum())(svpl)
    assert jnp.allclose(g_v.sum(), float(batch * num_latents))

    # TODO(synk): sample() (random per-latent codebook draw) is a host-side
    # utility of the torch module, not part of forward; not implemented here.
    print("KERNEL_OK")
</pallas_src>

<mosaic_0001>
module attributes {stable_mosaic.version = 11 : i64} {
  func.func @_quantize_kernel(%arg0: i32, %arg1: memref<32x512xf32, #tpu.memory_space<vmem>>, %arg2: memref<8x512xf32, #tpu.memory_space<vmem>>, %arg3: memref<32x512xf32, #tpu.memory_space<vmem>>, %arg4: memref<32x512xi8, #tpu.memory_space<vmem>>) attributes {dimension_semantics = [#tpu.dimension_semantics<parallel>], iteration_bounds = array<i64: 1>, scalar_prefetch = 0 : i64, scratch_operands = 0 : i64, tpu.core_type = #tpu.core_type<tc>, window_params = [{transform_indices = @transform_0, window_bounds = array<i64: 32, 512>}, {pipeline_mode = #tpu.pipeline_mode<synchronous>, transform_indices = @transform_1, window_bounds = array<i64: 8, 512>}, {transform_indices = @transform_2, window_bounds = array<i64: 32, 512>}, {transform_indices = @transform_3, window_bounds = array<i64: 32, 512>}]} {
    %c0 = arith.constant 0 : index
    %c0_0 = arith.constant 0 : index
    %0 = vector.load %arg1[%c0, %c0_0] : memref<32x512xf32, #tpu.memory_space<vmem>>, vector<32x512xf32>
    %c0_1 = arith.constant 0 : index
    %c0_2 = arith.constant 0 : index
    %1 = vector.load %arg2[%c0_1, %c0_2] : memref<8x512xf32, #tpu.memory_space<vmem>>, vector<1x512xf32>
    %2 = vector.broadcast %1 : vector<1x512xf32> to vector<32x512xf32>
    %3 = arith.subf %0, %2 : vector<32x512xf32>
    %4 = math.absf %3 : vector<32x512xf32>
    %5 = vector.shape_cast %1 : vector<1x512xf32> to vector<1x512xf32>
    %6 = vector.broadcast %5 : vector<1x512xf32> to vector<32x512xf32>
    %c0_i32 = arith.constant 0 : i32
    %7 = vector.broadcast %c0_i32 : i32 to vector<32x512xi32>
    %c1 = arith.constant 1 : index
    %c0_3 = arith.constant 0 : index
    %8 = vector.load %arg2[%c1, %c0_3] : memref<8x512xf32, #tpu.memory_space<vmem>>, vector<1x512xf32>
    %9 = vector.broadcast %8 : vector<1x512xf32> to vector<32x512xf32>
    %10 = arith.subf %0, %9 : vector<32x512xf32>
    %11 = math.absf %10 : vector<32x512xf32>
    %12 = arith.cmpf olt, %11, %4 : vector<32x512xf32>
    %13 = arith.select %12, %11, %4 : vector<32x512xi1>, vector<32x512xf32>
    %14 = vector.shape_cast %8 : vector<1x512xf32> to vector<1x512xf32>
    %15 = vector.broadcast %14 : vector<1x512xf32> to vector<32x512xf32>
    %16 = arith.select %12, %15, %6 : vector<32x512xi1>, vector<32x512xf32>
    %c1_i32 = arith.constant 1 : i32
    %17 = vector.broadcast %c1_i32 : i32 to vector<32x512xi32>
    %18 = arith.select %12, %17, %7 : vector<32x512xi1>, vector<32x512xi32>
    %c2 = arith.constant 2 : index
    %c0_4 = arith.constant 0 : index
    %19 = vector.load %arg2[%c2, %c0_4] : memref<8x512xf32, #tpu.memory_space<vmem>>, vector<1x512xf32>
    %20 = vector.broadcast %19 : vector<1x512xf32> to vector<32x512xf32>
    %21 = arith.subf %0, %20 : vector<32x512xf32>
    %22 = math.absf %21 : vector<32x512xf32>
    %23 = arith.cmpf olt, %22, %13 : vector<32x512xf32>
    %24 = arith.select %23, %22, %13 : vector<32x512xi1>, vector<32x512xf32>
    %25 = vector.shape_cast %19 : vector<1x512xf32> to vector<1x512xf32>
    %26 = vector.broadcast %25 : vector<1x512xf32> to vector<32x512xf32>
    %27 = arith.select %23, %26, %16 : vector<32x512xi1>, vector<32x512xf32>
    %c2_i32 = arith.constant 2 : i32
    %28 = vector.broadcast %c2_i32 : i32 to vector<32x512xi32>
    %29 = arith.select %23, %28, %18 : vector<32x512xi1>, vector<32x512xi32>
    %c3 = arith.constant 3 : index
    %c0_5 = arith.constant 0 : index
    %30 = vector.load %arg2[%c3, %c0_5] : memref<8x512xf32, #tpu.memory_space<vmem>>, vector<1x512xf32>
    %31 = vector.broadcast %30 : vector<1x512xf32> to vector<32x512xf32>
    %32 = arith.subf %0, %31 : vector<32x512xf32>
    %33 = math.absf %32 : vector<32x512xf32>
    %34 = arith.cmpf olt, %33, %24 : vector<32x512xf32>
    %35 = arith.select %34, %33, %24 : vector<32x512xi1>, vector<32x512xf32>
    %36 = vector.shape_cast %30 : vector<1x512xf32> to vector<1x512xf32>
    %37 = vector.broadcast %36 : vector<1x512xf32> to vector<32x512xf32>
    %38 = arith.select %34, %37, %27 : vector<32x512xi1>, vector<32x512xf32>
    %c3_i32 = arith.constant 3 : i32
    %39 = vector.broadcast %c3_i32 : i32 to vector<32x512xi32>
    %40 = arith.select %34, %39, %29 : vector<32x512xi1>, vector<32x512xi32>
    %c4 = arith.constant 4 : index
    %c0_6 = arith.constant 0 : index
    %41 = vector.load %arg2[%c4, %c0_6] : memref<8x512xf32, #tpu.memory_space<vmem>>, vector<1x512xf32>
    %42 = vector.broadcast %41 : vector<1x512xf32> to vector<32x512xf32>
    %43 = arith.subf %0, %42 : vector<32x512xf32>
    %44 = math.absf %43 : vector<32x512xf32>
    %45 = arith.cmpf olt, %44, %35 : vector<32x512xf32>
    %46 = arith.select %45, %44, %35 : vector<32x512xi1>, vector<32x512xf32>
    %47 = vector.shape_cast %41 : vector<1x512xf32> to vector<1x512xf32>
    %48 = vector.broadcast %47 : vector<1x512xf32> to vector<32x512xf32>
    %49 = arith.select %45, %48, %38 : vector<32x512xi1>, vector<32x512xf32>
    %c4_i32 = arith.constant 4 : i32
    %50 = vector.broadcast %c4_i32 : i32 to vector<32x512xi32>
    %51 = arith.select %45, %50, %40 : vector<32x512xi1>, vector<32x512xi32>
    %c5 = arith.constant 5 : index
    %c0_7 = arith.constant 0 : index
    %52 = vector.load %arg2[%c5, %c0_7] : memref<8x512xf32, #tpu.memory_space<vmem>>, vector<1x512xf32>
    %53 = vector.broadcast %52 : vector<1x512xf32> to vector<32x512xf32>
    %54 = arith.subf %0, %53 : vector<32x512xf32>
    %55 = math.absf %54 : vector<32x512xf32>
    %56 = arith.cmpf olt, %55, %46 : vector<32x512xf32>
    %57 = arith.select %56, %55, %46 : vector<32x512xi1>, vector<32x512xf32>
    %58 = vector.shape_cast %52 : vector<1x512xf32> to vector<1x512xf32>
    %59 = vector.broadcast %58 : vector<1x512xf32> to vector<32x512xf32>
    %60 = arith.select %56, %59, %49 : vector<32x512xi1>, vector<32x512xf32>
    %c5_i32 = arith.constant 5 : i32
    %61 = vector.broadcast %c5_i32 : i32 to vector<32x512xi32>
    %62 = arith.select %56, %61, %51 : vector<32x512xi1>, vector<32x512xi32>
    %c6 = arith.constant 6 : index
    %c0_8 = arith.constant 0 : index
    %63 = vector.load %arg2[%c6, %c0_8] : memref<8x512xf32, #tpu.memory_space<vmem>>, vector<1x512xf32>
    %64 = vector.broadcast %63 : vector<1x512xf32> to vector<32x512xf32>
    %65 = arith.subf %0, %64 : vector<32x512xf32>
    %66 = math.absf %65 : vector<32x512xf32>
    %67 = arith.cmpf olt, %66, %57 : vector<32x512xf32>
    %68 = arith.select %67, %66, %57 : vector<32x512xi1>, vector<32x512xf32>
    %69 = vector.shape_cast %63 : vector<1x512xf32> to vector<1x512xf32>
    %70 = vector.broadcast %69 : vector<1x512xf32> to vector<32x512xf32>
    %71 = arith.select %67, %70, %60 : vector<32x512xi1>, vector<32x512xf32>
    %c6_i32 = arith.constant 6 : i32
    %72 = vector.broadcast %c6_i32 : i32 to vector<32x512xi32>
    %73 = arith.select %67, %72, %62 : vector<32x512xi1>, vector<32x512xi32>
    %c7 = arith.constant 7 : index
    %c0_9 = arith.constant 0 : index
    %74 = vector.load %arg2[%c7, %c0_9] : memref<8x512xf32, #tpu.memory_space<vmem>>, vector<1x512xf32>
    %75 = vector.broadcast %74 : vector<1x512xf32> to vector<32x512xf32>
    %76 = arith.subf %0, %75 : vector<32x512xf32>
    %77 = math.absf %76 : vector<32x512xf32>
    %78 = arith.cmpf olt, %77, %68 : vector<32x512xf32>
    %79 = vector.shape_cast %74 : vector<1x512xf32> to vector<1x512xf32>
    %80 = vector.broadcast %79 : vector<1x512xf32> to vector<32x512xf32>
    %81 = arith.select %78, %80, %71 : vector<32x512xi1>, vector<32x512xf32>
    %c7_i32 = arith.constant 7 : i32
    %82 = vector.broadcast %c7_i32 : i32 to vector<32x512xi32>
    %83 = arith.select %78, %82, %73 : vector<32x512xi1>, vector<32x512xi32>
    %c0_10 = arith.constant 0 : index
    %c0_11 = arith.constant 0 : index
    %84 = vector.load %arg3[%c0_10, %c0_11] : memref<32x512xf32, #tpu.memory_space<vmem>>, vector<32x512xf32>
    tpu.vector_store %arg3[%c0_10, %c0_11], %81 {strides = array<i32>} : memref<32x512xf32, #tpu.memory_space<vmem>>, vector<32x512xf32>,
    %85 = arith.trunci %83 : vector<32x512xi32> to vector<32x512xi8>
    %c0_12 = arith.constant 0 : index
    %c0_13 = arith.constant 0 : index
    %86 = vector.load %arg4[%c0_12, %c0_13] : memref<32x512xi8, #tpu.memory_space<vmem>>, vector<32x512xi8>
    tpu.vector_store %arg4[%c0_12, %c0_13], %85 {strides = array<i32>} : memref<32x512xi8, #tpu.memory_space<vmem>>, vector<32x512xi8>,
    return
  }
  func.func @transform_0(%arg0: i32) -> (i32, i32) {
    %c0_i32 = arith.constant 0 : i32
    %c0_i32_0 = arith.constant 0 : i32
    return %arg0, %c0_i32 : i32, i32
  }
  func.func @transform_1(%arg0: i32) -> (i32, i32) {
    %c0_i32 = arith.constant 0 : i32
    %c0_i32_0 = arith.constant 0 : i32
    %c0_i32_1 = arith.constant 0 : i32
    return %c0_i32, %c0_i32_0 : i32, i32
  }
  func.func @transform_2(%arg0: i32) -> (i32, i32) {
    %c0_i32 = arith.constant 0 : i32
    %c0_i32_0 = arith.constant 0 : i32
    return %arg0, %c0_i32 : i32, i32
  }
  func.func @transform_3(%arg0: i32) -> (i32, i32) {
    %c0_i32 = arith.constant 0 : i32
    %c0_i32_0 = arith.constant 0 : i32
    return %arg0, %c0_i32 : i32, i32
  }
}

</mosaic_0001>

<bundles_post_ra>
// kernel: tile.9
= control target key start
LH: loop header
LB: loop body
LE: loop exit
PB: predicated region body
PF: predicated region fallthrough
CT: control target
= control target key end

     0   :  { %vm34_vm0 = vcmask 1043458   ;;  %s74_s6 = smov 3  ;;  %vm39_vm1 = vcmask 1045508   ;;  %vm44_vm2 = vcmask 1047558   ;;  %s77_s9 = smov 12  ;;  %vm3_vm3 = vcmask 261120   ;;  %s652_s0 = inlined_call_operand.vmem [shape: f32[8,16,32], index: 0, kind: input, shape index: {}]   ;;  %s653_s1 = inlined_call_operand.vmem [shape: f32[8,512], index: 1, kind: output, shape index: {}]  }
   0x1   :  { %v320_v0 = vld [vmem:[%s652_s0 + $0xb] ss:$16 sm:%s74_s6]   ;;  %s82_s10 = smov 48  ;;  %s87_s15 = smov 192  ;;  %vm48_vm4 = vcmask 1048320   ;;  %vm139_vm5 = vcmask 785920  }
   0x2   :  { %v321_v1 = vld [vmem:[%s652_s0 + $0xb] ss:$16 sm:%s77_s9]   ;;  %s29_s16 = smov 3  ;;  %s32_s21 = smov 12  ;;  %vm230_vm6 = vcmask 523520  }
   0x3   :  { %v322_v2 = vld [vmem:[%s652_s0 + $0xb] ss:$16 sm:%s82_s10]   ;;  %v80_v3 = vsel %vm34_vm0, %v321_v1, %v320_v0  ;;  %v311_v5 = vld [vmem:[%s652_s0 + $0x3] ss:$16 sm:%s29_s16]   ;;  %s37_s22 = smov 48  ;;  %s42_s27 = smov 192 }
   0x4   :  { %v323_v4 = vld [vmem:[%s652_s0 + $0xb] ss:$16 sm:%s87_s15]   ;;  %v85_v6 = vsel %vm39_vm1, %v322_v2, %v80_v3  ;;  %v312_v7 = vld [vmem:[%s652_s0 + $0x3] ss:$16 sm:%s32_s21]   ;;  %s97_s28 = smov 3  ;;  %s100_s4 = smov 12 }
   0x5   :  { %v313_v8 = vld [vmem:[%s652_s0 + $0x3] ss:$16 sm:%s37_s22]   ;;  %v90_v9 = vsel %vm44_vm2, %v323_v4, %v85_v6  ;;  %v35_v10 = vsel %vm34_vm0, %v312_v7, %v311_v5  ;;  %v325_v12 = vld [vmem:[%s652_s0 + $0xf] ss:$16 sm:%s97_s28]   ;;  %s105_s5 = smov 48  ;;  %s371_s6 = smov 96  }
   0x6   :  { %v314_v11 = vld [vmem:[%s652_s0 + $0x3] ss:$16 sm:%s42_s27]   ;;  %91 = vrot.lane.b32.xlu1 %v90_v9, %s371_s6  ;;  %v40_v13 = vsel %vm39_vm1, %v313_v8, %v35_v10  ;;  %s110_s9 = smov 192  ;;  %s51_s10 = smov 3 }
   0x7   :  { %v326_v14 = vld [vmem:[%s652_s0 + $0xf] ss:$16 sm:%s100_s4]   ;;  %v45_v15 = vsel %vm44_vm2, %v314_v11, %v40_v13  ;;  %s54_s15 = smov 12  ;;  %s59_s16 = smov 48  ;;  %v315_v20 = vld [vmem:[%s652_s0 + $0x7] ss:$16 sm:%s51_s10]  }
   0x8   :  { %v103_v16 = vsel %vm34_vm0, %v326_v14, %v325_v12  ;;  %v327_v17 = vld [vmem:[%s652_s0 + $0xf] ss:$16 sm:%s105_s5]   ;;  %46 = vrot.lane.b32.xlu0 %v45_v15, %s371_s6  ;;  %s64_s19 = smov 192  ;;  %s188_s24 = smov 3 }
   0x9   :  { %v328_v18 = vld [vmem:[%s652_s0 + $0xf] ss:$16 sm:%s110_s9]   ;;  %v108_v19 = vsel %vm39_vm1, %v327_v17, %v103_v16  ;;  %v316_v21 = vld [vmem:[%s652_s0 + $0x7] ss:$16 sm:%s54_s15]   ;;  %s191_s25 = smov 12  ;;  %s196_s30 = smov 48 }
   0xa   :  { %v317_v22 = vld [vmem:[%s652_s0 + $0x7] ss:$16 sm:%s59_s16]   ;;  %v57_v23 = vsel %vm34_vm0, %v316_v21, %v315_v20  ;;  %v344_v25 = vld [vmem:[%s652_s0 + $0xe] ss:$16 sm:%s188_s24]   ;;  %s201_s2 = smov 192  ;;  %v113_v26 = vsel %vm44_vm2, %v328_v18, %v108_v19  ;;  %s165_s5 = smov 3 }
   0xb   :  { %v318_v24 = vld [vmem:[%s652_s0 + $0x7] ss:$16 sm:%s64_s19]   ;;  %v62_v27 = vsel %vm39_vm1, %v317_v22, %v57_v23  ;;  %v345_v28 = vld [vmem:[%s652_s0 + $0xe] ss:$16 sm:%s191_s25]   ;;  %s168_s7 = smov 12  ;;  %s173_s10 = smov 48 }
   0xc   :  { %v339_v29 = vld [vmem:[%s652_s0 + $0xa] ss:$16 sm:%s165_s5]   ;;  %s178_s11 = smov 192  ;;  %v67_v30 = vsel %vm44_vm2, %v318_v24, %v62_v27  ;;  %v194_v31 = vsel %vm34_vm0, %v345_v28, %v344_v25  ;;  %v346_v32 = vld [vmem:[%s652_s0 + $0xe] ss:$16 sm:%s196_s30]   ;;  %s120_s16 = smov 3 }
   0xd   :  { %v340_v33 = vld [vmem:[%s652_s0 + $0xa] ss:$16 sm:%s168_s7]   ;;  %s123_s17 = smov 12  ;;  %v347_v34 = vld [vmem:[%s652_s0 + $0xe] ss:$16 sm:%s201_s2]   ;;  %s128_s22 = smov 48  ;;  %v199_v39 = vsel %vm39_vm1, %v346_v32, %v194_v31 }
   0xe   :  { %114 = vrot.lane.b32.xlu1 %v113_v26, %s371_s6  ;;  %v341_v35 = vld [vmem:[%s652_s0 + $0xa] ss:$16 sm:%s173_s10]   ;;  %s133_s23 = smov 192  ;;  %v171_v36 = vsel %vm34_vm0, %v340_v33, %v339_v29  ;;  %s256_s28 = smov 3  ;;  %v204_v49 = vsel %vm44_vm2, %v347_v34, %v199_v39  ;;  %v2_v20 = vld [vmem:[%s652_s0] ss:$4 sm:$0xff]  }
   0xf   :  { %v330_v37 = vld [vmem:[%s652_s0 + $0x2] ss:$16 sm:%s120_s16]   ;;  %s259_s30 = smov 12  ;;  %v342_v42 = vld [vmem:[%s652_s0 + $0xa] ss:$16 sm:%s178_s11]   ;;  %s264_s7 = smov 48  ;;  %v176_v45 = vsel %vm39_vm1, %v341_v35, %v171_v36 }
  0x10   :  { %v331_v38 = vld [vmem:[%s652_s0 + $0x2] ss:$16 sm:%s123_s17]   ;;  %68 = vrot.lane.b32.xlu0 %v67_v30, %s371_s6  ;;  %s233_s8 = smov 3  ;;  %s236_s13 = smov 12  ;;  %v181_v52 = vsel %vm44_vm2, %v342_v42, %v176_v45  ;;  %v302_v21 = vld [vmem:[%s652_s0 + $0x20] ss:$4 sm:$0xff]  }
  0x11   :  { %v126_v40 = vsel %vm34_vm0, %v331_v38, %v330_v37  ;;  %v332_v41 = vld [vmem:[%s652_s0 + $0x2] ss:$16 sm:%s128_s22]   ;;  %v358_v47 = vld [vmem:[%s652_s0 + $0x9] ss:$16 sm:%s256_s28]   ;;  %s241_s14 = smov 48  ;;  %s372_s15 = smov 64  }
  0x12   :  { %v131_v43 = vsel %vm39_vm1, %v332_v41, %v126_v40  ;;  %v333_v44 = vld [vmem:[%s652_s0 + $0x2] ss:$16 sm:%s133_s23]   ;;  %v359_v48 = vld [vmem:[%s652_s0 + $0x9] ss:$16 sm:%s259_s30]   ;;  %s269_s16 = smov 192  ;;  %s142_s17 = smov 3 }
  0x13   :  { %v136_v46 = vsel %vm44_vm2, %v333_v44, %v131_v43  ;;  %v353_v50 = vld [vmem:[%s652_s0 + $0x5] ss:$16 sm:%s233_s8]   ;;  %s145_s22 = smov 12  ;;  %s150_s23 = smov 48  ;;  %v262_v53 = vsel %vm34_vm0, %v359_v48, %v358_v47  ;;  %v360_v54 = vld [vmem:[%s652_s0 + $0x9] ss:$16 sm:%s264_s7]  }
  0x14   :  { %137 = vrot.lane.b32.xlu2 %v136_v46, %s372_s15  ;;  %v354_v51 = vld [vmem:[%s652_s0 + $0x5] ss:$16 sm:%s236_s13]   ;;  %s155_s28 = smov 192  ;;  %s211_s3 = smov 3  ;;  %v267_v61 = vsel %vm39_vm1, %v360_v54, %v262_v53  ;;  %v305_v22 = vld [vmem:[%s652_s0 + $0x40] ss:$4 sm:$0xff]  }
  0x15   :  { %v355_v55 = vld [vmem:[%s652_s0 + $0x5] ss:$16 sm:%s241_s14]   ;;  %v361_v56 = vld [vmem:[%s652_s0 + $0x9] ss:$16 sm:%s269_s16]   ;;  %s214_s4 = smov 12  ;;  %v239_v58 = vsel %vm34_vm0, %v354_v51, %v353_v50  ;;  %s246_s5 = smov 192 }
  0x16   :  { %205 = vrot.lane.b32.xlu1 %v204_v49, %s372_s15  ;;  %v334_v57 = vld [vmem:[%s652_s0 + $0x6] ss:$16 sm:%s142_s17]   ;;  %s219_s11 = smov 48  ;;  %v244_v3 = vsel %vm39_vm1, %v355_v55, %v239_v58  ;;  %v272_v8 = vsel %vm44_vm2, %v361_v56, %v267_v61  ;;  %s282_s24 = smov 12  ;;  %v308_v23 = vld [vmem:[%s652_s0 + $0x60] ss:$4 sm:$0xff]  }
  0x17   :  { %v335_v59 = vld [vmem:[%s652_s0 + $0x6] ss:$16 sm:%s145_s22]   ;;  %v349_v1 = vld [vmem:[%s652_s0 + $0x1] ss:$16 sm:%s211_s3]   ;;  %s373_s27 = smov 32   ;;  %s287_s2 = smov 48 }
  0x18   :  { %v336_v60 = vld [vmem:[%s652_s0 + $0x6] ss:$16 sm:%s150_s23]   ;;  %182 = vrot.lane.b32.xlu0 %v181_v52, %s372_s15  ;;  %v148_v62 = vsel %vm34_vm0, %v335_v59, %v334_v57  ;;  %s224_s23 = smov 192  ;;  %4 = vst.msk [vmem:[%s653_s1] ss:$8 sm:$0xf] %vm3_vm3, %v2_v20  }
  0x19   :  { %v337_v63 = vld [vmem:[%s652_s0 + $0x6] ss:$16 sm:%s155_s28]   ;;  %v153_v0 = vsel %vm39_vm1, %v336_v60, %v148_v62  ;;  %v350_v2 = vld [vmem:[%s652_s0 + $0x1] ss:$16 sm:%s214_s4]  }
  0x1a   :  { %v356_v4 = vld [vmem:[%s652_s0 + $0x5] ss:$16 sm:%s246_s5]   ;;  %v158_v5 = vsel %vm44_vm2, %v337_v63, %v153_v0  ;;  %v217_v6 = vsel %vm34_vm0, %v350_v2, %v349_v1  ;;  %v351_v7 = vld [vmem:[%s652_s0 + $0x1] ss:$16 sm:%s219_s11]   ;;  %s292_s5 = smov 192 }
  0x1b   :  { %v249_v9 = vsel %vm44_vm2, %v356_v4, %v244_v3  ;;  %v222_v10 = vsel %vm39_vm1, %v351_v7, %v217_v6  ;;  %v352_v11 = vld [vmem:[%s652_s0 + $0x1] ss:$16 sm:%s224_s23]   ;;  %v364_v13 = vld [vmem:[%s652_s0 + $0xd] ss:$16 sm:%s282_s24]  }
  0x1c   :  { %159 = vrot.lane.b32.xlu2 %v158_v5, %s372_s15  ;;  %s279_s15 = smov 3  ;;  %v227_v14 = vsel %vm44_vm2, %v352_v11, %v222_v10  ;;  %v365_v16 = vld [vmem:[%s652_s0 + $0xd] ss:$16 sm:%s287_s2]   ;;  %301 = vst.msk [vmem:[%s653_s1 - $0x1f] ss:$8 sm:$0xf0] %vm3_vm3, %v2_v20  }
  0x1d   :  { %v363_v12 = vld [vmem:[%s652_s0 + $0xd] ss:$16 sm:%s279_s15]   ;;  %303 = vst.msk [vmem:[%s653_s1 + $0x2] ss:$8 sm:$0xf] %vm3_vm3, %v302_v21  }
  0x1e   :  { %273 = vrot.lane.b32.xlu1 %v272_v8, %s373_s27  ;;  %v285_v15 = vsel %vm34_vm0, %v364_v13, %v363_v12  ;;  %v366_v18 = vld [vmem:[%s652_s0 + $0xd] ss:$16 sm:%s292_s5]   ;;  %304 = vst.msk [vmem:[%s653_s1 - $0x1d] ss:$8 sm:$0xf0] %vm3_vm3, %v302_v21  }
  0x1f   :  { %v290_v17 = vsel %vm39_vm1, %v365_v16, %v285_v15  ;;  %306 = vst.msk [vmem:[%s653_s1 + $0x4] ss:$8 sm:$0xf] %vm3_vm3, %v305_v22  }
  0x20   :  { %250 = vrot.lane.b32.xlu0 %v249_v9, %s373_s27  ;;  %v295_v19 = vsel %vm44_vm2, %v366_v18, %v290_v17  ;;  %307 = vst.msk [vmem:[%s653_s1 - $0x1b] ss:$8 sm:$0xf0] %vm3_vm3, %v305_v22  }
  0x21   :  { %309 = vst.msk [vmem:[%s653_s1 + $0x6] ss:$8 sm:$0xf] %vm3_vm3, %v308_v23  }
  0x22   :  { %310 = vst.msk [vmem:[%s653_s1 - $0x19] ss:$8 sm:$0xf0] %vm3_vm3, %v308_v23  }
  0x24   :  { %228 = vrot.lane.b32.xlu2 %v227_v14, %s373_s27 }
  0x2c   :  { %296 = vrot.lane.b32.xlu2 %v295_v19, %s373_s27 }
  0x6e   :  { %v138_v24 = vpop.permute.xlu2 %137  }
  0x76   :  { %v160_v25 = vpop.permute.xlu2 %159  }
  0x78   :  { %v92_v26 = vpop.permute.xlu1 %91  }
  0x79   :  { %324 = vst.msk [vmem:[%s653_s1 + $0x10] sm:$0xff] %vm48_vm4, %v92_v26  }
  0x7a   :  { %v47_v27 = vpop.permute.xlu0 %46  }
  0x7b   :  { %49 = vst.msk [vmem:[%s653_s1] sm:$0xff] %vm48_vm4, %v47_v27  }
  0x7c   :  { %140 = vst.msk [vmem:[%s653_s1] sm:$0xff] %vm139_vm5, %v138_v24  }
  0x7e   :  { %v229_v28 = vpop.permute.xlu2 %228  }
  0x7f   :  { %231 = vst.msk [vmem:[%s653_s1] sm:$0xff] %vm230_vm6, %v229_v28  }
  0x80   :  { %v115_v29 = vpop.permute.xlu1 %114  }
  0x81   :  { %329 = vst.msk [vmem:[%s653_s1 + $0x18] sm:$0xff] %vm48_vm4, %v115_v29  }
  0x82   :  { %v69_v30 = vpop.permute.xlu0 %68  }
  0x83   :  { %319 = vst.msk [vmem:[%s653_s1 + $0x8] sm:$0xff] %vm48_vm4, %v69_v30  }
  0x84   :  { %338 = vst.msk [vmem:[%s653_s1 + $0x8] sm:$0xff] %vm139_vm5, %v160_v25  }
  0x86   :  { %v297_v31 = vpop.permute.xlu2 %296  }
  0x88   :  { %v206_v32 = vpop.permute.xlu1 %205  }
  0x89   :  { %348 = vst.msk [vmem:[%s653_s1 + $0x18] sm:$0xff] %vm139_vm5, %v206_v32  }
  0x8a   :  { %v183_v33 = vpop.permute.xlu0 %182   ;;  %367 = vst.msk [vmem:[%s653_s1 + $0x18] sm:$0xff] %vm230_vm6, %v297_v31  }
  0x8b   :  { %343 = vst.msk [vmem:[%s653_s1 + $0x10] sm:$0xff] %vm139_vm5, %v183_v33  }
  0x90   :  { %v274_v34 = vpop.permute.xlu1 %273  }
  0x91   :  { %362 = vst.msk [vmem:[%s653_s1 + $0x10] sm:$0xff] %vm230_vm6, %v274_v34  }
  0x92   :  { %v251_v35 = vpop.permute.xlu0 %250  }
  0x93   :  { %357 = vst.msk [vmem:[%s653_s1 + $0x8] sm:$0xff] %vm230_vm6, %v251_v35  }

// kernel: quantized_latent_forward.1
= control target key start
LH: loop header
LB: loop body
LE: loop exit
PB: predicated region body
PF: predicated region fallthrough
CT: control target
= control target key end

     0   :  { %v1557_v41 = vmov 0   ;;  %s1553_s0 = inlined_call_operand.vmem [shape: f32[32,512], index: 0, kind: input, shape index: {}]   ;;  %s1554_s1 = inlined_call_operand.vmem [shape: f32[8,512], index: 1, kind: input, shape index: {}]   ;;  %s1555_s2 = inlined_call_operand.vmem [shape: f32[32,512], index: 2, kind: output, shape index: {0}]   ;;  %s1556_s3 = inlined_call_operand.vmem [shape: s8[32,512], index: 3, kind: output, shape index: {1}]  }
   0x1   :  { %v13_v0 = vld [vmem:[%s1553_s0] sm:$0xff]  ;;  %v884_v2 = vld [vmem:[%s1553_s0 + $0x8] sm:$0xff]  ;;  %v942_v20 = vld [vmem:[%s1553_s0 + $0x10] sm:$0xff] }
   0x2   :  { %v879_v1 = vld [vmem:[%s1554_s1] ss:$8 sm:$0xf]  ;;  %v892_v4 = vld [vmem:[%s1554_s1 + $0x1] ss:$8 sm:$0xf] }
   0x3   :  { %v887_v3 = vperm.slane %v879_v1, 0  ;;  %v895_v5 = vperm.slane %v879_v1, 1  ;;  %v898_v6 = vperm.slane %v892_v4, 0  ;;  %v903_v7 = vld [vmem:[%s1554_s1 + $0x2] ss:$8 sm:$0xf] }
   0x4   :  { %v906_v8 = vperm.slane %v892_v4, 1  ;;  %v909_v9 = vperm.slane %v879_v1, 2  ;;  %v913_v11 = vperm.slane %v903_v7, 0  ;;  %v918_v12 = vld [vmem:[%s1554_s1 + $0x3] ss:$8 sm:$0xf] }
   0x5   :  { %v39_v10 = vsub.f32 %v13_v0, %v887_v3  ;;  %v40_v13 = vsub.f32 %v884_v2, %v895_v5  ;;  %v923_v14 = vperm.slane %v903_v7, 1  ;;  %v82_v15 = vsub.f32 %v13_v0, %v898_v6  ;;  %v932_v17 = vld [vmem:[%s1554_s1 + $0x4] ss:$8 sm:$0xf] }
   0x6   :  { %v927_v16 = vperm.slane %v918_v12, 0  ;;  %v83_v18 = vsub.f32 %v884_v2, %v906_v8  ;;  %v937_v19 = vperm.slane %v918_v12, 1  ;;  %v189_v22 = vsub.f32 %v13_v0, %v913_v11  ;;  %v951_v24 = vld [vmem:[%s1554_s1 + $0x5] ss:$8 sm:$0xf] }
   0x7   :  { %v55_v21 = vand.u32 2147483647, %v39_v10  ;;  %v946_v23 = vperm.slane %v932_v17, 0  ;;  %v190_v25 = vsub.f32 %v884_v2, %v923_v14  ;;  %v98_v26 = vand.u32 2147483647, %v82_v15 }
   0x8   :  { %v296_v27 = vsub.f32 %v13_v0, %v927_v16  ;;  %v957_v28 = vperm.slane %v951_v24, 0  ;;  %v962_v29 = vld [vmem:[%s1554_s1 + $0x6] ss:$8 sm:$0xf]  ;;  %v297_v30 = vsub.f32 %v884_v2, %v937_v19  ;;  %v205_v31 = vand.u32 2147483647, %v189_v22 }
   0x9   :  { %v403_v32 = vsub.f32 %v13_v0, %v946_v23  ;;  %v968_v33 = vperm.slane %v962_v29, 0  ;;  %v973_v34 = vld [vmem:[%s1554_s1 + $0x7] ss:$8 sm:$0xf]  ;;  %v41_v35 = vsub.f32 %v942_v20, %v909_v9  ;;  %vm114_vm0 = vcmp.lt.f32.partialorder %v98_v26, %v55_v21 }
   0xa   :  { %v312_v36 = vand.u32 2147483647, %v296_v27  ;;  %v510_v37 = vsub.f32 %v13_v0, %v957_v28  ;;  %v979_v38 = vperm.slane %v973_v34, 0  ;;  %v130_v39 = vsel %vm114_vm0, %v98_v26, %v55_v21 }
   0xb   :  { %v146_v40 = vsel %vm114_vm0, %v898_v6, %v887_v3  ;;  %v162_v42 = vsel %vm114_vm0, 1, %v1557_v41  ;;  %v419_v43 = vand.u32 2147483647, %v403_v32  ;;  %vm221_vm1 = vcmp.lt.f32.partialorder %v205_v31, %v130_v39 }
   0xc   :  { %v526_v44 = vand.u32 2147483647, %v510_v37  ;;  %v617_v45 = vsub.f32 %v13_v0, %v968_v33  ;;  %v724_v46 = vsub.f32 %v13_v0, %v979_v38  ;;  %v237_v47 = vsel %vm221_vm1, %v205_v31, %v130_v39 }
   0xd   :  { %v253_v48 = vsel %vm221_vm1, %v913_v11, %v146_v40  ;;  %v269_v49 = vsel %vm221_vm1, 2, %v162_v42  ;;  %v56_v50 = vand.u32 2147483647, %v40_v13  ;;  %vm328_vm2 = vcmp.lt.f32.partialorder %v312_v36, %v237_v47 }
   0xe   :  { %v633_v51 = vand.u32 2147483647, %v617_v45  ;;  %v740_v52 = vand.u32 2147483647, %v724_v46  ;;  %v99_v53 = vand.u32 2147483647, %v83_v18  ;;  %v344_v54 = vsel %vm328_vm2, %v312_v36, %v237_v47 }
   0xf   :  { %v360_v55 = vsel %vm328_vm2, %v927_v16, %v253_v48  ;;  %v376_v56 = vsel %vm328_vm2, 3, %v269_v49  ;;  %v206_v57 = vand.u32 2147483647, %v190_v25  ;;  %vm435_vm3 = vcmp.lt.f32.partialorder %v419_v43, %v344_v54 }
  0x10   :  { %vm115_vm4 = vcmp.lt.f32.partialorder %v99_v53, %v56_v50  ;;  %v313_v58 = vand.u32 2147483647, %v297_v30  ;;  %v989_v59 = vperm.slane %v932_v17, 1  ;;  %v451_v60 = vsel %vm435_vm3, %v419_v43, %v344_v54 }
  0x11   :  { %v467_v61 = vsel %vm435_vm3, %v946_v23, %v360_v55  ;;  %v483_v62 = vsel %vm435_vm3, 4, %v376_v56  ;;  %v131_v63 = vsel %vm115_vm4, %v99_v53, %v56_v50  ;;  %vm542_vm5 = vcmp.lt.f32.partialorder %v526_v44, %v451_v60 }
  0x12   :  { %v147_v0 = vsel %vm115_vm4, %v906_v8, %v895_v5  ;;  %v163_v10 = vsel %vm115_vm4, 1, %v1557_v41  ;;  %vm222_vm6 = vcmp.lt.f32.partialorder %v206_v57, %v131_v63  ;;  %v558_v13 = vsel %vm542_vm5, %v526_v44, %v451_v60 }
  0x13   :  { %v574_v15 = vsel %vm542_vm5, %v957_v28, %v467_v61  ;;  %v590_v18 = vsel %vm542_vm5, 5, %v483_v62  ;;  %v238_v21 = vsel %vm222_vm6, %v206_v57, %v131_v63  ;;  %vm649_vm7 = vcmp.lt.f32.partialorder %v633_v51, %v558_v13 }
  0x14   :  { %v254_v22 = vsel %vm222_vm6, %v923_v14, %v147_v0  ;;  %v270_v25 = vsel %vm222_vm6, 2, %v163_v10  ;;  %vm329_vm8 = vcmp.lt.f32.partialorder %v313_v58, %v238_v21  ;;  %v665_v26 = vsel %vm649_vm7, %v633_v51, %v558_v13 }
  0x15   :  { %v681_v27 = vsel %vm649_vm7, %v968_v33, %v574_v15  ;;  %v697_v30 = vsel %vm649_vm7, 6, %v590_v18  ;;  %v345_v31 = vsel %vm329_vm8, %v313_v58, %v238_v21  ;;  %vm756_vm9 = vcmp.lt.f32.partialorder %v740_v52, %v665_v26 }
  0x16   :  { %v361_v32 = vsel %vm329_vm8, %v937_v19, %v254_v22  ;;  %v377_v36 = vsel %vm329_vm8, 3, %v270_v25  ;;  %v404_v37 = vsub.f32 %v884_v2, %v989_v59  ;;  %v772_v39 = vsel %vm756_vm9, %v979_v38, %v681_v27 }
  0x17   :  { %v1002_v40 = vsel %vm756_vm9, 7, %v697_v30  ;;  %v1005_v42 = vperm.slane %v951_v24, 1  ;;  %v1008_v43 = vperm.slane %v962_v29, 1  ;;  %804 = vst [vmem:[%s1555_s2] sm:$0xff] %v772_v39  ;;  %v1014_v45 = vperm.slane %v973_v34, 1 }
  0x18   :  { %v420_v44 = vand.u32 2147483647, %v404_v37  ;;  %v57_v46 = vand.u32 2147483647, %v41_v35  ;;  %v1017_v47 = vperm.slane %v892_v4, 2  ;;  %v1024_v50 = vperm.slane %v903_v7, 2 }
  0x19   :  { %v511_v48 = vsub.f32 %v884_v2, %v1005_v42  ;;  %v618_v49 = vsub.f32 %v884_v2, %v1008_v43  ;;  %v1027_v51 = vperm.slane %v918_v12, 2  ;;  %v725_v52 = vsub.f32 %v884_v2, %v1014_v45 }
  0x1a   :  { %vm436_vm10 = vcmp.lt.f32.partialorder %v420_v44, %v345_v31  ;;  %v84_v35 = vsub.f32 %v942_v20, %v1017_v47  ;;  %v1034_v53 = vperm.slane %v932_v17, 2  ;;  %v191_v62 = vsub.f32 %v942_v20, %v1024_v50 }
  0x1b   :  { %v452_v54 = vsel %vm436_vm10, %v420_v44, %v345_v31  ;;  %v468_v55 = vsel %vm436_vm10, %v989_v59, %v361_v32  ;;  %v484_v56 = vsel %vm436_vm10, 4, %v377_v36  ;;  %v527_v57 = vand.u32 2147483647, %v511_v48 }
  0x1c   :  { %v634_v58 = vand.u32 2147483647, %v618_v49  ;;  %v741_v60 = vand.u32 2147483647, %v725_v52  ;;  %v100_v61 = vand.u32 2147483647, %v84_v35  ;;  %v298_v2 = vsub.f32 %v942_v20, %v1027_v51 }
  0x1d   :  { %vm543_vm11 = vcmp.lt.f32.partialorder %v527_v57, %v452_v54  ;;  %v405_v63 = vsub.f32 %v942_v20, %v1034_v53  ;;  %v1044_v0 = vperm.slane %v951_v24, 2  ;;  %v207_v30 = vand.u32 2147483647, %v191_v62  ;;  %v1066_v35 = vld [vmem:[%s1553_s0 + $0x18] sm:$0xff] }
  0x1e   :  { %v559_v10 = vsel %vm543_vm11, %v527_v57, %v452_v54  ;;  %v575_v13 = vsel %vm543_vm11, %v1005_v42, %v468_v55  ;;  %v591_v15 = vsel %vm543_vm11, 5, %v484_v56  ;;  %vm116_vm12 = vcmp.lt.f32.partialorder %v100_v61, %v57_v46 }
  0x1f   :  { %vm650_vm13 = vcmp.lt.f32.partialorder %v634_v58, %v559_v10  ;;  %v132_v18 = vsel %vm116_vm12, %v100_v61, %v57_v46  ;;  %v148_v21 = vsel %vm116_vm12, %v1017_v47, %v909_v9  ;;  %v164_v22 = vsel %vm116_vm12, 1, %v1557_v41 }
  0x20   :  { %v666_v25 = vsel %vm650_vm13, %v634_v58, %v559_v10  ;;  %v682_v26 = vsel %vm650_vm13, %v1008_v43, %v575_v13  ;;  %v698_v27 = vsel %vm650_vm13, 6, %v591_v15  ;;  %v314_v31 = vand.u32 2147483647, %v298_v2 }
  0x21   :  { %vm757_vm14 = vcmp.lt.f32.partialorder %v741_v60, %v666_v25  ;;  %v421_v32 = vand.u32 2147483647, %v405_v63  ;;  %v512_v36 = vsub.f32 %v942_v20, %v1044_v0  ;;  %vm223_vm15 = vcmp.lt.f32.partialorder %v207_v30, %v132_v18 }
  0x22   :  { %v773_v37 = vsel %vm757_vm14, %v1014_v45, %v682_v26  ;;  %v1054_v39 = vsel %vm757_vm14, 7, %v698_v27  ;;  %v1057_v44 = vperm.slane %v962_v29, 2  ;;  %v239_v46 = vsel %vm223_vm15, %v207_v30, %v132_v18 }
  0x23   :  { %805 = vst [vmem:[%s1555_s2 + $0x8] sm:$0xff] %v773_v37  ;;  %v255_v48 = vsel %vm223_vm15, %v1024_v50, %v148_v21  ;;  %v271_v49 = vsel %vm223_vm15, 2, %v164_v22  ;;  %v528_v52 = vand.u32 2147483647, %v512_v36  ;;  %vm330_vm0 = vcmp.lt.f32.partialorder %v314_v31, %v239_v46 }
  0x24   :  { %v619_v54 = vsub.f32 %v942_v20, %v1057_v44  ;;  %v1071_v55 = vperm.slane %v973_v34, 2  ;;  %v1074_v56 = vperm.slane %v879_v1, 3  ;;  %v346_v57 = vsel %vm330_vm0, %v314_v31, %v239_v46 }
  0x25   :  { %v362_v58 = vsel %vm330_vm0, %v1027_v51, %v255_v48  ;;  %v378_v60 = vsel %vm330_vm0, 3, %v271_v49  ;;  %v1078_v61 = vperm.slane %v892_v4, 3  ;;  %vm437_vm1 = vcmp.lt.f32.partialorder %v421_v32, %v346_v57 }
  0x26   :  { %v635_v62 = vand.u32 2147483647, %v619_v54  ;;  %v726_v2 = vsub.f32 %v942_v20, %v1071_v55  ;;  %v42_v63 = vsub.f32 %v1066_v35, %v1074_v56  ;;  %v453_v10 = vsel %vm437_vm1, %v421_v32, %v346_v57 }
  0x27   :  { %v469_v13 = vsel %vm437_vm1, %v1034_v53, %v362_v58  ;;  %v485_v1 = vsel %vm437_vm1, 4, %v378_v60  ;;  %v85_v15 = vsub.f32 %v1066_v35, %v1078_v61  ;;  %vm544_vm2 = vcmp.lt.f32.partialorder %v528_v52, %v453_v10 }
  0x28   :  { %v742_v18 = vand.u32 2147483647, %v726_v2  ;;  %v58_v21 = vand.u32 2147483647, %v42_v63  ;;  %v1088_v4 = vperm.slane %v903_v7, 3  ;;  %v560_v22 = vsel %vm544_vm2, %v528_v52, %v453_v10 }
  0x29   :  { %v576_v25 = vsel %vm544_vm2, %v1044_v0, %v469_v13  ;;  %v592_v20 = vsel %vm544_vm2, 5, %v485_v1  ;;  %v101_v26 = vand.u32 2147483647, %v85_v15  ;;  %vm651_vm3 = vcmp.lt.f32.partialorder %v635_v62, %v560_v22 }
  0x2a   :  { %v192_v27 = vsub.f32 %v1066_v35, %v1088_v4  ;;  %v1094_v30 = vperm.slane %v918_v12, 3  ;;  %v1097_v31 = vperm.slane %v932_v17, 3  ;;  %v667_v32 = vsel %vm651_vm3, %v635_v62, %v560_v22  ;;  %v1106_v12 = vld [vmem:[%s1553_s0 + $0x20] sm:$0xff] }
  0x2b   :  { %v683_v36 = vsel %vm651_vm3, %v1057_v44, %v576_v25  ;;  %v699_v7 = vsel %vm651_vm3, 6, %v592_v20  ;;  %vm117_vm4 = vcmp.lt.f32.partialorder %v101_v26, %v58_v21  ;;  %vm758_vm5 = vcmp.lt.f32.partialorder %v742_v18, %v667_v32 }
  0x2c   :  { %v133_v37 = vsel %vm117_vm4, %v101_v26, %v58_v21  ;;  %v149_v46 = vsel %vm117_vm4, %v1078_v61, %v1074_v56  ;;  %v165_v48 = vsel %vm117_vm4, 1, %v1557_v41  ;;  %v774_v17 = vsel %vm758_vm5, %v1071_v55, %v683_v36 }
  0x2d   :  { %v1109_v49 = vsel %vm758_vm5, 7, %v699_v7  ;;  %v208_v52 = vand.u32 2147483647, %v192_v27  ;;  %v299_v54 = vsub.f32 %v1066_v35, %v1094_v30  ;;  %806 = vst [vmem:[%s1555_s2 + $0x10] sm:$0xff] %v774_v17  ;;  %v406_v57 = vsub.f32 %v1066_v35, %v1097_v31 }
  0x2e   :  { %v1119_v58 = vperm.slane %v951_v24, 3  ;;  %v1122_v60 = vperm.slane %v962_v29, 3  ;;  %v1125_v62 = vperm.slane %v973_v34, 3  ;;  %v43_v63 = vsub.f32 %v1106_v12, %v887_v3 }
  0x2f   :  { %vm224_vm6 = vcmp.lt.f32.partialorder %v208_v52, %v133_v37  ;;  %v315_v2 = vand.u32 2147483647, %v299_v54  ;;  %v86_v10 = vsub.f32 %v1106_v12, %v898_v6  ;;  %v422_v24 = vand.u32 2147483647, %v406_v57 }
  0x30   :  { %v240_v13 = vsel %vm224_vm6, %v208_v52, %v133_v37  ;;  %v256_v1 = vsel %vm224_vm6, %v1088_v4, %v149_v46  ;;  %v272_v15 = vsel %vm224_vm6, 2, %v165_v48  ;;  %v513_v29 = vsub.f32 %v1066_v35, %v1119_v58 }
  0x31   :  { %vm331_vm7 = vcmp.lt.f32.partialorder %v315_v2, %v240_v13  ;;  %v620_v34 = vsub.f32 %v1066_v35, %v1122_v60  ;;  %v727_v18 = vsub.f32 %v1066_v35, %v1125_v62  ;;  %v59_v20 = vand.u32 2147483647, %v43_v63 }
  0x32   :  { %v347_v21 = vsel %vm331_vm7, %v315_v2, %v240_v13  ;;  %v363_v22 = vsel %vm331_vm7, %v1094_v30, %v256_v1  ;;  %v379_v25 = vsel %vm331_vm7, 3, %v272_v15  ;;  %v529_v26 = vand.u32 2147483647, %v513_v29 }
  0x33   :  { %vm438_vm8 = vcmp.lt.f32.partialorder %v422_v24, %v347_v21  ;;  %v636_v27 = vand.u32 2147483647, %v620_v34  ;;  %v743_v32 = vand.u32 2147483647, %v727_v18  ;;  %v102_v46 = vand.u32 2147483647, %v86_v10 }
  0x34   :  { %v454_v36 = vsel %vm438_vm8, %v422_v24, %v347_v21  ;;  %v470_v7 = vsel %vm438_vm8, %v1097_v31, %v363_v22  ;;  %v486_v37 = vsel %vm438_vm8, 4, %v379_v25  ;;  %v193_v48 = vsub.f32 %v1106_v12, %v913_v11  ;;  %v1156_v21 = vld [vmem:[%s1553_s0 + $0x28] sm:$0xff] }
  0x35   :  { %vm545_vm9 = vcmp.lt.f32.partialorder %v529_v26, %v454_v36  ;;  %v300_v35 = vsub.f32 %v1106_v12, %v927_v16  ;;  %v407_v17 = vsub.f32 %v1106_v12, %v946_v23  ;;  %vm118_vm10 = vcmp.lt.f32.partialorder %v102_v46, %v59_v20 }
  0x36   :  { %v561_v52 = vsel %vm545_vm9, %v529_v26, %v454_v36  ;;  %v577_v54 = vsel %vm545_vm9, %v1119_v58, %v470_v7  ;;  %v593_v57 = vsel %vm545_vm9, 5, %v486_v37  ;;  %v134_v2 = vsel %vm118_vm10, %v102_v46, %v59_v20 }
  0x37   :  { %vm652_vm11 = vcmp.lt.f32.partialorder %v636_v27, %v561_v52  ;;  %v150_v63 = vsel %vm118_vm10, %v898_v6, %v887_v3  ;;  %v166_v10 = vsel %vm118_vm10, 1, %v1557_v41  ;;  %v209_v24 = vand.u32 2147483647, %v193_v48 }
  0x38   :  { %v668_v13 = vsel %vm652_vm11, %v636_v27, %v561_v52  ;;  %v684_v1 = vsel %vm652_vm11, %v1122_v60, %v577_v54  ;;  %v700_v15 = vsel %vm652_vm11, 6, %v593_v57  ;;  %v316_v29 = vand.u32 2147483647, %v300_v35 }
  0x39   :  { %vm759_vm12 = vcmp.lt.f32.partialorder %v743_v32, %v668_v13  ;;  %v423_v34 = vand.u32 2147483647, %v407_v17  ;;  %v514_v18 = vsub.f32 %v1106_v12, %v957_v28  ;;  %vm225_vm13 = vcmp.lt.f32.partialorder %v209_v24, %v134_v2 }
  0x3a   :  { %v775_v22 = vsel %vm759_vm12, %v1125_v62, %v684_v1  ;;  %v1159_v25 = vsel %vm759_vm12, 7, %v700_v15  ;;  %v621_v20 = vsub.f32 %v1106_v12, %v968_v33  ;;  %v241_v26 = vsel %vm225_vm13, %v209_v24, %v134_v2 }
  0x3b   :  { %807 = vst [vmem:[%s1555_s2 + $0x18] sm:$0xff] %v775_v22  ;;  %v257_v27 = vsel %vm225_vm13, %v913_v11, %v150_v63  ;;  %v273_v32 = vsel %vm225_vm13, 2, %v166_v10  ;;  %v530_v36 = vand.u32 2147483647, %v514_v18  ;;  %vm332_vm14 = vcmp.lt.f32.partialorder %v316_v29, %v241_v26 }
  0x3c   :  { %v637_v7 = vand.u32 2147483647, %v621_v20  ;;  %v728_v37 = vsub.f32 %v1106_v12, %v979_v38  ;;  %v44_v46 = vsub.f32 %v1156_v21, %v895_v5  ;;  %v348_v48 = vsel %vm332_vm14, %v316_v29, %v241_v26 }
  0x3d   :  { %v364_v35 = vsel %vm332_vm14, %v927_v16, %v257_v27  ;;  %v380_v17 = vsel %vm332_vm14, 3, %v273_v32  ;;  %v87_v52 = vsub.f32 %v1156_v21, %v906_v8  ;;  %vm439_vm15 = vcmp.lt.f32.partialorder %v423_v34, %v348_v48 }
  0x3e   :  { %v744_v54 = vand.u32 2147483647, %v728_v37  ;;  %v60_v57 = vand.u32 2147483647, %v44_v46  ;;  %v194_v2 = vsub.f32 %v1156_v21, %v923_v14  ;;  %v455_v63 = vsel %vm439_vm15, %v423_v34, %v348_v48 }
  0x3f   :  { %v471_v10 = vsel %vm439_vm15, %v946_v23, %v364_v35  ;;  %v487_v12 = vsel %vm439_vm15, 4, %v380_v17  ;;  %v103_v13 = vand.u32 2147483647, %v87_v52  ;;  %vm546_vm0 = vcmp.lt.f32.partialorder %v530_v36, %v455_v63 }
  0x40   :  { %v210_v1 = vand.u32 2147483647, %v194_v2  ;;  %v301_v15 = vsub.f32 %v1156_v21, %v937_v19  ;;  %v408_v24 = vsub.f32 %v1156_v21, %v989_v59  ;;  %v562_v29 = vsel %vm546_vm0, %v530_v36, %v455_v63  ;;  %v1189_v36 = vld [vmem:[%s1553_s0 + $0x30] sm:$0xff] }
  0x41   :  { %v578_v18 = vsel %vm546_vm0, %v957_v28, %v471_v10  ;;  %v594_v22 = vsel %vm546_vm0, 5, %v487_v12  ;;  %vm119_vm1 = vcmp.lt.f32.partialorder %v103_v13, %v60_v57  ;;  %vm653_vm2 = vcmp.lt.f32.partialorder %v637_v7, %v562_v29 }
  0x42   :  { %v135_v20 = vsel %vm119_vm1, %v103_v13, %v60_v57  ;;  %v151_v34 = vsel %vm119_vm1, %v906_v8, %v895_v5  ;;  %v167_v26 = vsel %vm119_vm1, 1, %v1557_v41  ;;  %v669_v27 = vsel %vm653_vm2, %v637_v7, %v562_v29 }
  0x43   :  { %v685_v32 = vsel %vm653_vm2, %v968_v33, %v578_v18  ;;  %v701_v37 = vsel %vm653_vm2, 6, %v594_v22  ;;  %vm226_vm3 = vcmp.lt.f32.partialorder %v210_v1, %v135_v20  ;;  %vm760_vm4 = vcmp.lt.f32.partialorder %v744_v54, %v669_v27 }
  0x44   :  { %v242_v46 = vsel %vm226_vm3, %v210_v1, %v135_v20  ;;  %v258_v48 = vsel %vm226_vm3, %v923_v14, %v151_v34  ;;  %v274_v35 = vsel %vm226_vm3, 2, %v167_v26  ;;  %v776_v17 = vsel %vm760_vm4, %v979_v38, %v685_v32 }
  0x45   :  { %v1193_v52 = vsel %vm760_vm4, 7, %v701_v37  ;;  %v317_v57 = vand.u32 2147483647, %v301_v15  ;;  %v424_v7 = vand.u32 2147483647, %v408_v24  ;;  %808 = vst [vmem:[%s1555_s2 + $0x20] sm:$0xff] %v776_v17  ;;  %v515_v2 = vsub.f32 %v1156_v21, %v1005_v42 }
  0x46   :  { %v622_v54 = vsub.f32 %v1156_v21, %v1008_v43  ;;  %v729_v63 = vsub.f32 %v1156_v21, %v1014_v45  ;;  %v45_v10 = vsub.f32 %v1189_v36, %v909_v9  ;;  %v88_v12 = vsub.f32 %v1189_v36, %v1017_v47 }
  0x47   :  { %vm333_vm5 = vcmp.lt.f32.partialorder %v317_v57, %v242_v46  ;;  %v195_v13 = vsub.f32 %v1189_v36, %v1024_v50  ;;  %v302_v1 = vsub.f32 %v1189_v36, %v1027_v51  ;;  %v531_v18 = vand.u32 2147483647, %v515_v2 }
  0x48   :  { %v349_v15 = vsel %vm333_vm5, %v317_v57, %v242_v46  ;;  %v365_v24 = vsel %vm333_vm5, %v937_v19, %v258_v48  ;;  %v381_v29 = vsel %vm333_vm5, 3, %v274_v35  ;;  %v638_v21 = vand.u32 2147483647, %v622_v54 }
  0x49   :  { %vm440_vm6 = vcmp.lt.f32.partialorder %v424_v7, %v349_v15  ;;  %v745_v22 = vand.u32 2147483647, %v729_v63  ;;  %v61_v20 = vand.u32 2147483647, %v45_v10  ;;  %v104_v32 = vand.u32 2147483647, %v88_v12 }
  0x4a   :  { %v456_v34 = vsel %vm440_vm6, %v424_v7, %v349_v15  ;;  %v472_v26 = vsel %vm440_vm6, %v989_v59, %v365_v24  ;;  %v488_v27 = vsel %vm440_vm6, 4, %v381_v29  ;;  %v211_v37 = vand.u32 2147483647, %v195_v13  ;;  %v20_v24 = vld [vmem:[%s1553_s0 + $0x38] sm:$0xff] }
  0x4b   :  { %vm547_vm7 = vcmp.lt.f32.partialorder %v531_v18, %v456_v34  ;;  %v318_v17 = vand.u32 2147483647, %v302_v1  ;;  %v409_v41 = vsub.f32 %v1189_v36, %v1034_v53  ;;  %vm120_vm8 = vcmp.lt.f32.partialorder %v104_v32, %v61_v20 }
  0x4c   :  { %v563_v46 = vsel %vm547_vm7, %v531_v18, %v456_v34  ;;  %v579_v48 = vsel %vm547_vm7, %v1005_v42, %v472_v26  ;;  %v595_v35 = vsel %vm547_vm7, 5, %v488_v27  ;;  %v136_v57 = vsel %vm120_vm8, %v104_v32, %v61_v20 }
  0x4d   :  { %vm654_vm9 = vcmp.lt.f32.partialorder %v638_v21, %v563_v46  ;;  %v152_v7 = vsel %vm120_vm8, %v1017_v47, %v909_v9  ;;  %v1559_v2 = vmov 0   ;;  %vm227_vm10 = vcmp.lt.f32.partialorder %v211_v37, %v136_v57 }
  0x4e   :  { %v168_v54 = vsel %vm120_vm8, 1, %v1559_v2  ;;  %v670_v63 = vsel %vm654_vm9, %v638_v21, %v563_v46  ;;  %v686_v10 = vsel %vm654_vm9, %v1008_v43, %v579_v48  ;;  %v702_v12 = vsel %vm654_vm9, 6, %v595_v35 }
  0x4f   :  { %vm761_vm11 = vcmp.lt.f32.partialorder %v745_v22, %v670_v63  ;;  %v243_v13 = vsel %vm227_vm10, %v211_v37, %v136_v57  ;;  %v259_v1 = vsel %vm227_vm10, %v1024_v50, %v152_v7  ;;  %v275_v15 = vsel %vm227_vm10, 2, %v168_v54 }
  0x50   :  { %v777_v29 = vsel %vm761_vm11, %v1014_v45, %v686_v10  ;;  %v1226_v18 = vsel %vm761_vm11, 7, %v702_v12  ;;  %vm334_vm12 = vcmp.lt.f32.partialorder %v318_v17, %v243_v13  ;;  %v425_v20 = vand.u32 2147483647, %v409_v41 }
  0x51   :  { %1560 = vst [vmem:[#allocation2_spill] sm:$0xff] %v1226_v18  ;;  %v350_v21 = vsel %vm334_vm12, %v318_v17, %v243_v13  ;;  %v366_v22 = vsel %vm334_vm12, %v1027_v51, %v259_v1  ;;  %v382_v34 = vsel %vm334_vm12, 3, %v275_v15  ;;  %v516_v26 = vsub.f32 %v1189_v36, %v1044_v0 }
  0x52   :  { %809 = vst [vmem:[%s1555_s2 + $0x28] sm:$0xff] %v777_v29  ;;  %vm441_vm13 = vcmp.lt.f32.partialorder %v425_v20, %v350_v21  ;;  %v623_v27 = vsub.f32 %v1189_v36, %v1057_v44  ;;  %v730_v32 = vsub.f32 %v1189_v36, %v1071_v55  ;;  %v46_v41 = vsub.f32 %v20_v24, %v1074_v56 }
  0x53   :  { %v457_v37 = vsel %vm441_vm13, %v425_v20, %v350_v21  ;;  %v473_v46 = vsel %vm441_vm13, %v1034_v53, %v366_v22  ;;  %v489_v48 = vsel %vm441_vm13, 4, %v382_v34  ;;  %v532_v17 = vand.u32 2147483647, %v516_v26 }
  0x54   :  { %v639_v35 = vand.u32 2147483647, %v623_v27  ;;  %v746_v57 = vand.u32 2147483647, %v730_v32  ;;  %v62_v7 = vand.u32 2147483647, %v46_v41  ;;  %v89_v54 = vsub.f32 %v20_v24, %v1078_v61 }
  0x55   :  { %vm548_vm14 = vcmp.lt.f32.partialorder %v532_v17, %v457_v37  ;;  %v196_v63 = vsub.f32 %v20_v24, %v1088_v4  ;;  %v303_v10 = vsub.f32 %v20_v24, %v1094_v30  ;;  %v410_v12 = vsub.f32 %v20_v24, %v1097_v31 }
  0x56   :  { %v564_v36 = vsel %vm548_vm14, %v532_v17, %v457_v37  ;;  %v580_v13 = vsel %vm548_vm14, %v1044_v0, %v473_v46  ;;  %v596_v1 = vsel %vm548_vm14, 5, %v489_v48  ;;  %v105_v15 = vand.u32 2147483647, %v89_v54  ;;  %v1252_v37 = vld [vmem:[%s1553_s0 + $0x40] sm:$0xff] }
  0x57   :  { %vm655_vm15 = vcmp.lt.f32.partialorder %v639_v35, %v564_v36  ;;  %v212_v29 = vand.u32 2147483647, %v196_v63  ;;  %v319_v20 = vand.u32 2147483647, %v303_v10  ;;  %v426_v21 = vand.u32 2147483647, %v410_v12 }
  0x58   :  { %v671_v22 = vsel %vm655_vm15, %v639_v35, %v564_v36  ;;  %v687_v34 = vsel %vm655_vm15, %v1057_v44, %v580_v13  ;;  %v703_v26 = vsel %vm655_vm15, 6, %v596_v1  ;;  %vm121_vm0 = vcmp.lt.f32.partialorder %v105_v15, %v62_v7 }
  0x59   :  { %vm762_vm1 = vcmp.lt.f32.partialorder %v746_v57, %v671_v22  ;;  %v137_v27 = vsel %vm121_vm0, %v105_v15, %v62_v7  ;;  %v153_v32 = vsel %vm121_vm0, %v1078_v61, %v1074_v56  ;;  %v169_v41 = vsel %vm121_vm0, 1, %v1559_v2 }
  0x5a   :  { %v778_v46 = vsel %vm762_vm1, %v1071_v55, %v687_v34  ;;  %v1255_v48 = vsel %vm762_vm1, 7, %v703_v26  ;;  %vm228_vm2 = vcmp.lt.f32.partialorder %v212_v29, %v137_v27  ;;  %v517_v17 = vsub.f32 %v20_v24, %v1119_v58 }
  0x5b   :  { %1561 = vst [vmem:[#allocation3_spill] sm:$0xff] %v1255_v48  ;;  %v244_v35 = vsel %vm228_vm2, %v212_v29, %v137_v27  ;;  %v260_v57 = vsel %vm228_vm2, %v1088_v4, %v153_v32  ;;  %v276_v7 = vsel %vm228_vm2, 2, %v169_v41  ;;  %v624_v54 = vsub.f32 %v20_v24, %v1122_v60 }
  0x5c   :  { %810 = vst [vmem:[%s1555_s2 + $0x30] sm:$0xff] %v778_v46  ;;  %vm335_vm3 = vcmp.lt.f32.partialorder %v319_v20, %v244_v35  ;;  %v533_v63 = vand.u32 2147483647, %v517_v17  ;;  %v731_v10 = vsub.f32 %v20_v24, %v1125_v62  ;;  %v47_v12 = vsub.f32 %v1252_v37, %v887_v3 }
  0x5d   :  { %v351_v36 = vsel %vm335_vm3, %v319_v20, %v244_v35  ;;  %v367_v13 = vsel %vm335_vm3, %v1094_v30, %v260_v57  ;;  %v383_v1 = vsel %vm335_vm3, 3, %v276_v7  ;;  %v640_v15 = vand.u32 2147483647, %v624_v54 }
  0x5e   :  { %vm442_vm4 = vcmp.lt.f32.partialorder %v426_v21, %v351_v36  ;;  %v747_v22 = vand.u32 2147483647, %v731_v10  ;;  %v63_v29 = vand.u32 2147483647, %v47_v12  ;;  %v90_v34 = vsub.f32 %v1252_v37, %v898_v6 }
  0x5f   :  { %v458_v26 = vsel %vm442_vm4, %v426_v21, %v351_v36  ;;  %v474_v27 = vsel %vm442_vm4, %v1097_v31, %v367_v13  ;;  %v490_v32 = vsel %vm442_vm4, 4, %v383_v1  ;;  %v197_v24 = vsub.f32 %v1252_v37, %v913_v11 }
  0x60   :  { %vm549_vm5 = vcmp.lt.f32.partialorder %v533_v63, %v458_v26  ;;  %v106_v41 = vand.u32 2147483647, %v90_v34  ;;  %v304_v20 = vsub.f32 %v1252_v37, %v927_v16  ;;  %v411_v46 = vsub.f32 %v1252_v37, %v946_v23 }
  0x61   :  { %v565_v17 = vsel %vm549_vm5, %v533_v63, %v458_v26  ;;  %v581_v35 = vsel %vm549_vm5, %v1119_v58, %v474_v27  ;;  %v597_v57 = vsel %vm549_vm5, 5, %v490_v32  ;;  %v213_v7 = vand.u32 2147483647, %v197_v24 }
  0x62   :  { %vm656_vm6 = vcmp.lt.f32.partialorder %v640_v15, %v565_v17  ;;  %vm122_vm7 = vcmp.lt.f32.partialorder %v106_v41, %v63_v29  ;;  %v320_v21 = vand.u32 2147483647, %v304_v20  ;;  %v427_v54 = vand.u32 2147483647, %v411_v46 }
  0x63   :  { %v672_v10 = vsel %vm656_vm6, %v640_v15, %v565_v17  ;;  %v688_v12 = vsel %vm656_vm6, %v1122_v60, %v581_v35  ;;  %v704_v36 = vsel %vm656_vm6, 6, %v597_v57  ;;  %v138_v13 = vsel %vm122_vm7, %v106_v41, %v63_v29  ;;  %v22_v15 = vld [vmem:[%s1553_s0 + $0x48] sm:$0xff] }
  0x64   :  { %vm763_vm8 = vcmp.lt.f32.partialorder %v747_v22, %v672_v10  ;;  %v154_v1 = vsel %vm122_vm7, %v898_v6, %v887_v3  ;;  %v170_v34 = vsel %vm122_vm7, 1, %v1559_v2  ;;  %vm229_vm9 = vcmp.lt.f32.partialorder %v213_v7, %v138_v13 }
  0x65   :  { %v779_v63 = vsel %vm763_vm8, %v1125_v62, %v688_v12  ;;  %v1282_v26 = vsel %vm763_vm8, 7, %v704_v36  ;;  %v245_v27 = vsel %vm229_vm9, %v213_v7, %v138_v13  ;;  %v261_v32 = vsel %vm229_vm9, %v913_v11, %v154_v1 }
  0x66   :  { %1562 = vst [vmem:[#allocation4_spill] sm:$0xff] %v1282_v26  ;;  %v277_v22 = vsel %vm229_vm9, 2, %v170_v34  ;;  %vm336_vm10 = vcmp.lt.f32.partialorder %v320_v21, %v245_v27  ;;  %v518_v29 = vsub.f32 %v1252_v37, %v957_v28  ;;  %v625_v24 = vsub.f32 %v1252_v37, %v968_v33 }
  0x67   :  { %811 = vst [vmem:[%s1555_s2 + $0x38] sm:$0xff] %v779_v63  ;;  %v352_v41 = vsel %vm336_vm10, %v320_v21, %v245_v27  ;;  %v368_v20 = vsel %vm336_vm10, %v927_v16, %v261_v32  ;;  %v384_v46 = vsel %vm336_vm10, 3, %v277_v22  ;;  %v732_v17 = vsub.f32 %v1252_v37, %v979_v38 }
  0x68   :  { %vm443_vm11 = vcmp.lt.f32.partialorder %v427_v54, %v352_v41  ;;  %v534_v35 = vand.u32 2147483647, %v518_v29  ;;  %v641_v57 = vand.u32 2147483647, %v625_v24  ;;  %v48_v7 = vsub.f32 %v22_v15, %v895_v5 }
  0x69   :  { %v459_v10 = vsel %vm443_vm11, %v427_v54, %v352_v41  ;;  %v475_v12 = vsel %vm443_vm11, %v946_v23, %v368_v20  ;;  %v491_v36 = vsel %vm443_vm11, 4, %v384_v46  ;;  %v748_v13 = vand.u32 2147483647, %v732_v17 }
  0x6a   :  { %vm550_vm12 = vcmp.lt.f32.partialorder %v534_v35, %v459_v10  ;;  %v64_v1 = vand.u32 2147483647, %v48_v7  ;;  %v91_v21 = vsub.f32 %v22_v15, %v906_v8  ;;  %v198_v34 = vsub.f32 %v22_v15, %v923_v14 }
  0x6b   :  { %v566_v63 = vsel %vm550_vm12, %v534_v35, %v459_v10  ;;  %v582_v27 = vsel %vm550_vm12, %v957_v28, %v475_v12  ;;  %v598_v37 = vsel %vm550_vm12, 5, %v491_v36  ;;  %v305_v32 = vsub.f32 %v22_v15, %v937_v19 }
  0x6c   :  { %vm657_vm13 = vcmp.lt.f32.partialorder %v641_v57, %v566_v63  ;;  %v107_v22 = vand.u32 2147483647, %v91_v21  ;;  %v214_v29 = vand.u32 2147483647, %v198_v34  ;;  %v412_v54 = vsub.f32 %v22_v15, %v989_v59 }
  0x6d   :  { %v673_v24 = vsel %vm657_vm13, %v641_v57, %v566_v63  ;;  %v689_v41 = vsel %vm657_vm13, %v968_v33, %v582_v27  ;;  %v705_v20 = vsel %vm657_vm13, 6, %v598_v37  ;;  %v321_v46 = vand.u32 2147483647, %v305_v32  ;;  %v23_v57 = vld [vmem:[%s1553_s0 + $0x50] sm:$0xff] }
  0x6e   :  { %vm764_vm14 = vcmp.lt.f32.partialorder %v748_v13, %v673_v24  ;;  %vm123_vm15 = vcmp.lt.f32.partialorder %v107_v22, %v64_v1  ;;  %v428_v17 = vand.u32 2147483647, %v412_v54  ;;  %v519_v35 = vsub.f32 %v22_v15, %v1005_v42 }
  0x6f   :  { %v780_v7 = vsel %vm764_vm14, %v979_v38, %v689_v41  ;;  %v1308_v10 = vsel %vm764_vm14, 7, %v705_v20  ;;  %v139_v12 = vsel %vm123_vm15, %v107_v22, %v64_v1  ;;  %v155_v36 = vsel %vm123_vm15, %v906_v8, %v895_v5 }
  0x70   :  { %1563 = vst [vmem:[#allocation5_spill] sm:$0xff] %v1308_v10  ;;  %v171_v13 = vsel %vm123_vm15, 1, %v1559_v2  ;;  %vm230_vm0 = vcmp.lt.f32.partialorder %v214_v29, %v139_v12  ;;  %v535_v21 = vand.u32 2147483647, %v519_v35  ;;  %v626_v34 = vsub.f32 %v22_v15, %v1008_v43 }
  0x71   :  { %812 = vst [vmem:[%s1555_s2 + $0x40] sm:$0xff] %v780_v7  ;;  %v246_v63 = vsel %vm230_vm0, %v214_v29, %v139_v12  ;;  %v262_v1 = vsel %vm230_vm0, %v923_v14, %v155_v36  ;;  %v278_v27 = vsel %vm230_vm0, 2, %v171_v13  ;;  %v733_v37 = vsub.f32 %v22_v15, %v1014_v45 }
  0x72   :  { %vm337_vm1 = vcmp.lt.f32.partialorder %v321_v46, %v246_v63  ;;  %v642_v32 = vand.u32 2147483647, %v626_v34  ;;  %v49_v22 = vsub.f32 %v23_v57, %v909_v9  ;;  %v92_v54 = vsub.f32 %v23_v57, %v1017_v47 }
  0x73   :  { %v353_v24 = vsel %vm337_vm1, %v321_v46, %v246_v63  ;;  %v369_v41 = vsel %vm337_vm1, %v937_v19, %v262_v1  ;;  %v385_v20 = vsel %vm337_vm1, 3, %v278_v27  ;;  %v749_v7 = vand.u32 2147483647, %v733_v37 }
  0x74   :  { %vm444_vm2 = vcmp.lt.f32.partialorder %v428_v17, %v353_v24  ;;  %v65_v35 = vand.u32 2147483647, %v49_v22  ;;  %v108_v10 = vand.u32 2147483647, %v92_v54  ;;  %v199_v29 = vsub.f32 %v23_v57, %v1024_v50 }
  0x75   :  { %v460_v12 = vsel %vm444_vm2, %v428_v17, %v353_v24  ;;  %v476_v36 = vsel %vm444_vm2, %v989_v59, %v369_v41  ;;  %v492_v15 = vsel %vm444_vm2, 4, %v385_v20  ;;  %v306_v13 = vsub.f32 %v23_v57, %v1027_v51  ;;  %v1337_v20 = vld [vmem:[%s1553_s0 + $0x58] sm:$0xff] }
  0x76   :  { %vm551_vm3 = vcmp.lt.f32.partialorder %v535_v21, %v460_v12  ;;  %vm124_vm4 = vcmp.lt.f32.partialorder %v108_v10, %v65_v35  ;;  %v215_v34 = vand.u32 2147483647, %v199_v29  ;;  %v413_v46 = vsub.f32 %v23_v57, %v1034_v53 }
  0x77   :  { %v567_v63 = vsel %vm551_vm3, %v535_v21, %v460_v12  ;;  %v583_v1 = vsel %vm551_vm3, %v1005_v42, %v476_v36  ;;  %v599_v27 = vsel %vm551_vm3, 5, %v492_v15  ;;  %v140_v37 = vsel %vm124_vm4, %v108_v10, %v65_v35 }
  0x78   :  { %vm658_vm5 = vcmp.lt.f32.partialorder %v642_v32, %v567_v63  ;;  %v156_v22 = vsel %vm124_vm4, %v1017_v47, %v909_v9  ;;  %v172_v17 = vsel %vm124_vm4, 1, %v1559_v2  ;;  %vm231_vm6 = vcmp.lt.f32.partialorder %v215_v34, %v140_v37 }
  0x79   :  { %v674_v54 = vsel %vm658_vm5, %v642_v32, %v567_v63  ;;  %v690_v24 = vsel %vm658_vm5, %v1008_v43, %v583_v1  ;;  %v247_v41 = vsel %vm231_vm6, %v215_v34, %v140_v37  ;;  %v263_v21 = vsel %vm231_vm6, %v1024_v50, %v156_v22 }
  0x7a   :  { %vm765_vm7 = vcmp.lt.f32.partialorder %v749_v7, %v674_v54  ;;  %v279_v10 = vsel %vm231_vm6, 2, %v172_v17  ;;  %v322_v35 = vand.u32 2147483647, %v306_v13  ;;  %v706_v29 = vsel %vm658_vm5, 6, %v599_v27 }
  0x7b   :  { %v781_v12 = vsel %vm765_vm7, %v1014_v45, %v690_v24  ;;  %v429_v36 = vand.u32 2147483647, %v413_v46  ;;  %v520_v32 = vsub.f32 %v23_v57, %v1044_v0  ;;  %v627_v15 = vsub.f32 %v23_v57, %v1057_v44 }
  0x7c   :  { %813 = vst [vmem:[%s1555_s2 + $0x48] sm:$0xff] %v781_v12  ;;  %vm338_vm8 = vcmp.lt.f32.partialorder %v322_v35, %v247_v41  ;;  %v734_v34 = vsub.f32 %v23_v57, %v1071_v55  ;;  %v50_v63 = vsub.f32 %v1337_v20, %v1074_v56  ;;  %v93_v48 = vsub.f32 %v1337_v20, %v1078_v61 }
  0x7d   :  { %v354_v13 = vsel %vm338_vm8, %v322_v35, %v247_v41  ;;  %v370_v1 = vsel %vm338_vm8, %v1027_v51, %v263_v21  ;;  %v386_v27 = vsel %vm338_vm8, 3, %v279_v10  ;;  %v536_v37 = vand.u32 2147483647, %v520_v32 }
  0x7e   :  { %vm445_vm9 = vcmp.lt.f32.partialorder %v429_v36, %v354_v13  ;;  %v643_v46 = vand.u32 2147483647, %v627_v15  ;;  %v750_v22 = vand.u32 2147483647, %v734_v34  ;;  %v66_v17 = vand.u32 2147483647, %v50_v63 }
  0x7f   :  { %v461_v24 = vsel %vm445_vm9, %v429_v36, %v354_v13  ;;  %v477_v12 = vsel %vm445_vm9, %v1034_v53, %v370_v1  ;;  %v493_v26 = vsel %vm445_vm9, 4, %v386_v27  ;;  %v200_v57 = vsub.f32 %v1337_v20, %v1088_v4 }
  0x80   :  { %vm552_vm10 = vcmp.lt.f32.partialorder %v536_v37, %v461_v24  ;;  %v307_v41 = vsub.f32 %v1337_v20, %v1094_v30  ;;  %v414_v21 = vsub.f32 %v1337_v20, %v1097_v31  ;;  %v1361_v10 = vsel %vm765_vm7, 7, %v706_v29 }
  0x81   :  { %1564 = vst [vmem:[#allocation6_spill] sm:$0xff] %v1361_v10  ;;  %v568_v35 = vsel %vm552_vm10, %v536_v37, %v461_v24  ;;  %v584_v36 = vsel %vm552_vm10, %v1044_v0, %v477_v12  ;;  %v109_v32 = vand.u32 2147483647, %v93_v48  ;;  %v600_v15 = vsel %vm552_vm10, 5, %v493_v26  ;;  %v1371_v48 = vld [vmem:[%s1553_s0 + $0x60] sm:$0xff] }
  0x82   :  { %vm659_vm11 = vcmp.lt.f32.partialorder %v643_v46, %v568_v35  ;;  %v216_v34 = vand.u32 2147483647, %v200_v57  ;;  %v323_v63 = vand.u32 2147483647, %v307_v41  ;;  %v430_v27 = vand.u32 2147483647, %v414_v21 }
  0x83   :  { %v675_v13 = vsel %vm659_vm11, %v643_v46, %v568_v35  ;;  %v691_v1 = vsel %vm659_vm11, %v1057_v44, %v584_v36  ;;  %vm125_vm12 = vcmp.lt.f32.partialorder %v109_v32, %v66_v17  ;;  %v707_v26 = vsel %vm659_vm11, 6, %v600_v15 }
  0x84   :  { %vm766_vm13 = vcmp.lt.f32.partialorder %v750_v22, %v675_v13  ;;  %v141_v18 = vsel %vm125_vm12, %v109_v32, %v66_v17  ;;  %v157_v7 = vsel %vm125_vm12, %v1078_v61, %v1074_v56  ;;  %v173_v54 = vsel %vm125_vm12, 1, %v1559_v2 }
  0x85   :  { %v782_v29 = vsel %vm766_vm13, %v1071_v55, %v691_v1  ;;  %vm232_vm14 = vcmp.lt.f32.partialorder %v216_v34, %v141_v18  ;;  %v521_v37 = vsub.f32 %v1337_v20, %v1119_v58  ;;  %v628_v12 = vsub.f32 %v1337_v20, %v1122_v60 }
  0x86   :  { %814 = vst [vmem:[%s1555_s2 + $0x50] sm:$0xff] %v782_v29  ;;  %v248_v46 = vsel %vm232_vm14, %v216_v34, %v141_v18  ;;  %v264_v17 = vsel %vm232_vm14, %v1088_v4, %v157_v7  ;;  %v280_v24 = vsel %vm232_vm14, 2, %v173_v54  ;;  %v735_v41 = vsub.f32 %v1337_v20, %v1125_v62 }
  0x87   :  { %vm339_vm15 = vcmp.lt.f32.partialorder %v323_v63, %v248_v46  ;;  %v537_v57 = vand.u32 2147483647, %v521_v37  ;;  %v51_v21 = vsub.f32 %v1371_v48, %v887_v3  ;;  %v644_v15 = vand.u32 2147483647, %v628_v12 }
  0x88   :  { %v355_v35 = vsel %vm339_vm15, %v323_v63, %v248_v46  ;;  %v371_v36 = vsel %vm339_vm15, %v1094_v30, %v264_v17  ;;  %v387_v32 = vsel %vm339_vm15, 3, %v280_v24  ;;  %v751_v18 = vand.u32 2147483647, %v735_v41 }
  0x89   :  { %vm446_vm0 = vcmp.lt.f32.partialorder %v430_v27, %v355_v35  ;;  %v67_v34 = vand.u32 2147483647, %v51_v21  ;;  %v94_v1 = vsub.f32 %v1371_v48, %v898_v6  ;;  %v201_v20 = vsub.f32 %v1371_v48, %v913_v11 }
  0x8a   :  { %v462_v7 = vsel %vm446_vm0, %v430_v27, %v355_v35  ;;  %v478_v54 = vsel %vm446_vm0, %v1097_v31, %v371_v36  ;;  %v494_v29 = vsel %vm446_vm0, 4, %v387_v32  ;;  %v308_v63 = vsub.f32 %v1371_v48, %v927_v16 }
  0x8b   :  { %vm553_vm1 = vcmp.lt.f32.partialorder %v537_v57, %v462_v7  ;;  %v110_v37 = vand.u32 2147483647, %v94_v1  ;;  %v415_v46 = vsub.f32 %v1371_v48, %v946_v23  ;;  %v1398_v17 = vsel %vm766_vm13, 7, %v707_v26 }
  0x8c   :  { %v569_v24 = vsel %vm553_vm1, %v537_v57, %v462_v7  ;;  %v585_v27 = vsel %vm553_vm1, %v1119_v58, %v478_v54  ;;  %v217_v12 = vand.u32 2147483647, %v201_v20  ;;  %v601_v41 = vsel %vm553_vm1, 5, %v494_v29 }
  0x8d   :  { %vm660_vm2 = vcmp.lt.f32.partialorder %v644_v15, %v569_v24  ;;  %vm126_vm3 = vcmp.lt.f32.partialorder %v110_v37, %v67_v34  ;;  %v324_v21 = vand.u32 2147483647, %v308_v63  ;;  %v431_v1 = vand.u32 2147483647, %v415_v46 }
  0x8e   :  { %v676_v35 = vsel %vm660_vm2, %v644_v15, %v569_v24  ;;  %v692_v36 = vsel %vm660_vm2, %v1122_v60, %v585_v27  ;;  %v142_v32 = vsel %vm126_vm3, %v110_v37, %v67_v34  ;;  %v158_v10 = vsel %vm126_vm3, %v898_v6, %v887_v3  ;;  %v26_v15 = vld [vmem:[%s1553_s0 + $0x68] sm:$0xff] }
  0x8f   :  { %vm767_vm4 = vcmp.lt.f32.partialorder %v751_v18, %v676_v35  ;;  %v174_v22 = vsel %vm126_vm3, 1, %v1559_v2  ;;  %vm233_vm5 = vcmp.lt.f32.partialorder %v217_v12, %v142_v32  ;;  %v708_v13 = vsel %vm660_vm2, 6, %v601_v41 }
  0x90   :  { %v783_v26 = vsel %vm767_vm4, %v1125_v62, %v692_v36  ;;  %v249_v57 = vsel %vm233_vm5, %v217_v12, %v142_v32  ;;  %v265_v7 = vsel %vm233_vm5, %v913_v11, %v158_v10  ;;  %v281_v34 = vsel %vm233_vm5, 2, %v174_v22 }
  0x91   :  { %815 = vst [vmem:[%s1555_s2 + $0x58] sm:$0xff] %v783_v26  ;;  %vm340_vm6 = vcmp.lt.f32.partialorder %v324_v21, %v249_v57  ;;  %v522_v3 = vsub.f32 %v1371_v48, %v957_v28  ;;  %v629_v6 = vsub.f32 %v1371_v48, %v968_v33  ;;  %v736_v10 = vsub.f32 %v1371_v48, %v979_v38 }
  0x92   :  { %v356_v54 = vsel %vm340_vm6, %v324_v21, %v249_v57  ;;  %v372_v29 = vsel %vm340_vm6, %v927_v16, %v265_v7  ;;  %v388_v11 = vsel %vm340_vm6, 3, %v281_v34  ;;  %v52_v63 = vsub.f32 %v26_v15, %v895_v5 }
  0x93   :  { %vm447_vm7 = vcmp.lt.f32.partialorder %v431_v1, %v356_v54  ;;  %v538_v20 = vand.u32 2147483647, %v522_v3  ;;  %v645_v37 = vand.u32 2147483647, %v629_v6  ;;  %v1423_v12 = vand.u32 2147483647, %v736_v10 }
  0x94   :  { %v463_v46 = vsel %vm447_vm7, %v431_v1, %v356_v54  ;;  %v479_v24 = vsel %vm447_vm7, %v946_v23, %v372_v29  ;;  %v495_v27 = vsel %vm447_vm7, 4, %v388_v11  ;;  %v68_v41 = vand.u32 2147483647, %v52_v63 }
  0x95   :  { %vm554_vm8 = vcmp.lt.f32.partialorder %v538_v20, %v463_v46  ;;  %v95_v21 = vsub.f32 %v26_v15, %v906_v8  ;;  %v202_v16 = vsub.f32 %v26_v15, %v923_v14  ;;  %v309_v22 = vsub.f32 %v26_v15, %v937_v19 }
  0x96   :  { %v570_v36 = vsel %vm554_vm8, %v538_v20, %v463_v46  ;;  %v586_v48 = vsel %vm554_vm8, %v957_v28, %v479_v24  ;;  %v602_v32 = vsel %vm554_vm8, 5, %v495_v27  ;;  %v416_v23 = vsub.f32 %v26_v15, %v989_v59 }
  0x97   :  { %vm661_vm9 = vcmp.lt.f32.partialorder %v645_v37, %v570_v36  ;;  %v111_v26 = vand.u32 2147483647, %v95_v21  ;;  %v218_v1 = vand.u32 2147483647, %v202_v16  ;;  %v1431_v57 = vsel %vm767_vm4, 7, %v708_v13 }
  0x98   :  { %v677_v7 = vsel %vm661_vm9, %v645_v37, %v570_v36  ;;  %v693_v34 = vsel %vm661_vm9, %v968_v33, %v586_v48  ;;  %v709_v3 = vsel %vm661_vm9, 6, %v602_v32  ;;  %v325_v6 = vand.u32 2147483647, %v309_v22  ;;  %v27_v33 = vld [vmem:[%s1553_s0 + $0x70] sm:$0xff] }
  0x99   :  { %vm768_vm10 = vcmp.lt.f32.partialorder %v1423_v12, %v677_v7  ;;  %vm127_vm11 = vcmp.lt.f32.partialorder %v111_v26, %v68_v41  ;;  %v523_v28 = vsub.f32 %v26_v15, %v1005_v42  ;;  %v432_v35 = vand.u32 2147483647, %v416_v23 }
  0x9a   :  { %v784_v54 = vsel %vm768_vm10, %v979_v38, %v693_v34  ;;  %v143_v29 = vsel %vm127_vm11, %v111_v26, %v68_v41  ;;  %v159_v18 = vsel %vm127_vm11, %v906_v8, %v895_v5  ;;  %v175_v13 = vsel %vm127_vm11, 1, %v1559_v2 }
  0x9b   :  { %816 = vst [vmem:[%s1555_s2 + $0x60] sm:$0xff] %v784_v54  ;;  %vm234_vm12 = vcmp.lt.f32.partialorder %v218_v1, %v143_v29  ;;  %v539_v11 = vand.u32 2147483647, %v523_v28  ;;  %v630_v10 = vsub.f32 %v26_v15, %v1008_v43  ;;  %v737_v5 = vsub.f32 %v26_v15, %v1014_v45 }
  0x9c   :  { %v250_v38 = vsel %vm234_vm12, %v218_v1, %v143_v29  ;;  %v266_v20 = vsel %vm234_vm12, %v923_v14, %v159_v18  ;;  %v282_v37 = vsel %vm234_vm12, 2, %v175_v13  ;;  %v53_v63 = vsub.f32 %v27_v33, %v909_v9 }
  0x9d   :  { %vm341_vm13 = vcmp.lt.f32.partialorder %v325_v6, %v250_v38  ;;  %v646_v8 = vand.u32 2147483647, %v630_v10  ;;  %v96_v46 = vsub.f32 %v27_v33, %v1017_v47  ;;  %v753_v21 = vand.u32 2147483647, %v737_v5 }
  0x9e   :  { %v357_v24 = vsel %vm341_vm13, %v325_v6, %v250_v38  ;;  %v373_v27 = vsel %vm341_vm13, %v937_v19, %v266_v20  ;;  %v389_v41 = vsel %vm341_vm13, 3, %v282_v37  ;;  %v69_v16 = vand.u32 2147483647, %v53_v63 }
  0x9f   :  { %vm448_vm14 = vcmp.lt.f32.partialorder %v432_v35, %v357_v24  ;;  %v112_v36 = vand.u32 2147483647, %v96_v46  ;;  %v203_v48 = vsub.f32 %v27_v33, %v1024_v50  ;;  %v310_v22 = vsub.f32 %v27_v33, %v1027_v51 }
  0xa0   :  { %v464_v14 = vsel %vm448_vm14, %v432_v35, %v357_v24  ;;  %v480_v32 = vsel %vm448_vm14, %v989_v59, %v373_v27  ;;  %v496_v15 = vsel %vm448_vm14, 4, %v389_v41  ;;  %v417_v1 = vsub.f32 %v27_v33, %v1034_v53 }
  0xa1   :  { %vm555_vm15 = vcmp.lt.f32.partialorder %v539_v11, %v464_v14  ;;  %vm128_vm0 = vcmp.lt.f32.partialorder %v112_v36, %v69_v16  ;;  %v219_v26 = vand.u32 2147483647, %v203_v48  ;;  %v1464_v59 = vsel %vm768_vm10, 7, %v709_v3 }
  0xa2   :  { %v571_v23 = vsel %vm555_vm15, %v539_v11, %v464_v14  ;;  %v587_v19 = vsel %vm555_vm15, %v1005_v42, %v480_v32  ;;  %v603_v34 = vsel %vm555_vm15, 5, %v496_v15  ;;  %v144_v6 = vsel %vm128_vm0, %v112_v36, %v69_v16  ;;  %v1470_v42 = vld [vmem:[%s1553_s0 + $0x78] sm:$0xff] }
  0xa3   :  { %vm662_vm1 = vcmp.lt.f32.partialorder %v646_v8, %v571_v23  ;;  %v160_v28 = vsel %vm128_vm0, %v1017_v47, %v909_v9  ;;  %v176_v54 = vsel %vm128_vm0, 1, %v1559_v2  ;;  %vm235_vm2 = vcmp.lt.f32.partialorder %v219_v26, %v144_v6 }
  0xa4   :  { %v678_v29 = vsel %vm662_vm1, %v646_v8, %v571_v23  ;;  %v694_v18 = vsel %vm662_vm1, %v1008_v43, %v587_v19  ;;  %v251_v35 = vsel %vm235_vm2, %v219_v26, %v144_v6  ;;  %v267_v13 = vsel %vm235_vm2, %v1024_v50, %v160_v28 }
  0xa5   :  { %vm769_vm3 = vcmp.lt.f32.partialorder %v753_v21, %v678_v29  ;;  %v283_v9 = vsel %vm235_vm2, 2, %v176_v54  ;;  %v326_v47 = vand.u32 2147483647, %v310_v22  ;;  %v710_v11 = vsel %vm662_vm1, 6, %v603_v34 }
  0xa6   :  { %v785_v12 = vsel %vm769_vm3, %v1014_v45, %v694_v18  ;;  %v433_v7 = vand.u32 2147483647, %v417_v1  ;;  %v524_v3 = vsub.f32 %v27_v33, %v1044_v0  ;;  %v631_v43 = vsub.f32 %v27_v33, %v1057_v44 }
  0xa7   :  { %817 = vst [vmem:[%s1555_s2 + $0x68] sm:$0xff] %v785_v12  ;;  %vm342_vm4 = vcmp.lt.f32.partialorder %v326_v47, %v251_v35  ;;  %v738_v10 = vsub.f32 %v27_v33, %v1071_v55  ;;  %v54_v50 = vsub.f32 %v1470_v42, %v1074_v56  ;;  %v97_v33 = vsub.f32 %v1470_v42, %v1078_v61 }
  0xa8   :  { %v358_v38 = vsel %vm342_vm4, %v326_v47, %v251_v35  ;;  %v374_v20 = vsel %vm342_vm4, %v1027_v51, %v267_v13  ;;  %v390_v37 = vsel %vm342_vm4, 3, %v283_v9  ;;  %v540_v45 = vand.u32 2147483647, %v524_v3 }
  0xa9   :  { %vm449_vm5 = vcmp.lt.f32.partialorder %v433_v7, %v358_v38  ;;  %v647_v5 = vand.u32 2147483647, %v631_v43  ;;  %v1484_v8 = vand.u32 2147483647, %v738_v10  ;;  %v70_v63 = vand.u32 2147483647, %v54_v50 }
  0xaa   :  { %v465_v46 = vsel %vm449_vm5, %v433_v7, %v358_v38  ;;  %v481_v24 = vsel %vm449_vm5, %v1034_v53, %v374_v20  ;;  %v497_v27 = vsel %vm449_vm5, 4, %v390_v37  ;;  %v204_v41 = vsub.f32 %v1470_v42, %v1088_v4  ;;  %v1566_v43 = vld [vmem:[#allocation3_spill] sm:$0xff]  ;;  %v1567_v10 = vld [vmem:[#allocation4_spill] sm:$0xff]  ;;  %v1569_v50 = vld [vmem:[#allocation6_spill] sm:$0xff] }
  0xab   :  { %vm556_vm6 = vcmp.lt.f32.partialorder %v540_v45, %v465_v46  ;;  %v311_v51 = vsub.f32 %v1470_v42, %v1094_v30  ;;  %v418_v16 = vsub.f32 %v1470_v42, %v1097_v31  ;;  %v1496_v36 = vsel %vm769_vm3, 7, %v710_v11  ;;  %v1565_v11 = vld [vmem:[#allocation2_spill] sm:$0xff] }
  0xac   :  { %v572_v48 = vsel %vm556_vm6, %v540_v45, %v465_v46  ;;  %v588_v53 = vsel %vm556_vm6, %v1044_v0, %v481_v24  ;;  %v113_v14 = vand.u32 2147483647, %v97_v33  ;;  %v604_v32 = vsel %vm556_vm6, 5, %v497_v27 }
  0xad   :  { %vm663_vm7 = vcmp.lt.f32.partialorder %v647_v5, %v572_v48  ;;  %v220_v15 = vand.u32 2147483647, %v204_v41  ;;  %v327_v22 = vand.u32 2147483647, %v311_v51  ;;  %v434_v23 = vand.u32 2147483647, %v418_v16 }
  0xae   :  { %v679_v26 = vsel %vm663_vm7, %v647_v5, %v572_v48  ;;  %v695_v1 = vsel %vm663_vm7, %v1057_v44, %v588_v53  ;;  %vm129_vm8 = vcmp.lt.f32.partialorder %v113_v14, %v70_v63  ;;  %v711_v6 = vsel %vm663_vm7, 6, %v604_v32 }
  0xaf   :  { %vm770_vm9 = vcmp.lt.f32.partialorder %v1484_v8, %v679_v26  ;;  %v145_v19 = vsel %vm129_vm8, %v113_v14, %v70_v63  ;;  %v161_v21 = vsel %vm129_vm8, %v1078_v61, %v1074_v56  ;;  %v177_v34 = vsel %vm129_vm8, 1, %v1559_v2 }
  0xb0   :  { %v786_v0 = vsel %vm770_vm9, %v1071_v55, %v695_v1  ;;  %vm236_vm10 = vcmp.lt.f32.partialorder %v220_v15, %v145_v19  ;;  %v525_v28 = vsub.f32 %v1470_v42, %v1119_v58  ;;  %v632_v56 = vsub.f32 %v1470_v42, %v1122_v60 }
  0xb1   :  { %818 = vst [vmem:[%s1555_s2 + $0x70] sm:$0xff] %v786_v0  ;;  %v252_v44 = vsel %vm236_vm10, %v220_v15, %v145_v19  ;;  %v268_v54 = vsel %vm236_vm10, %v1088_v4, %v161_v21  ;;  %v284_v29 = vsel %vm236_vm10, 2, %v177_v34  ;;  %v739_v55 = vsub.f32 %v1470_v42, %v1125_v62 }
  0xb2   :  { %vm343_vm11 = vcmp.lt.f32.partialorder %v327_v22, %v252_v44  ;;  %v541_v61 = vand.u32 2147483647, %v525_v28  ;;  %v820_v2 = vpack.c.b16 %v1054_v39, %v1002_v40  ;;  %v648_v9 = vand.u32 2147483647, %v632_v56 }
  0xb3   :  { %v359_v18 = vsel %vm343_vm11, %v327_v22, %v252_v44  ;;  %v375_v35 = vsel %vm343_vm11, %v1094_v30, %v268_v54  ;;  %v391_v13 = vsel %vm343_vm11, 3, %v284_v29  ;;  %v755_v47 = vand.u32 2147483647, %v739_v55  ;;  %v1568_v30 = vld [vmem:[#allocation5_spill] sm:$0xff] }
  0xb4   :  { %vm450_vm12 = vcmp.lt.f32.partialorder %v434_v23, %v359_v18  ;;  %v821_v4 = vpack.c.b16 %v1159_v25, %v1109_v49  ;;  %v823_v12 = vpack.c.b16 %v1565_v11, %v1193_v52  ;;  %v824_v40 = vpack.c.b16 %v1567_v10, %v1566_v43 }
  0xb5   :  { %v466_v7 = vsel %vm450_vm12, %v434_v23, %v359_v18  ;;  %v482_v3 = vsel %vm450_vm12, %v1097_v31, %v375_v35  ;;  %v498_v42 = vsel %vm450_vm12, 4, %v391_v13  ;;  %v826_v38 = vpack.c.b16 %v1569_v50, %v1568_v30 }
  0xb6   :  { %vm557_vm13 = vcmp.lt.f32.partialorder %v541_v61, %v466_v7  ;;  %v822_v39 = vpack.c.b8 %v821_v4, %v820_v2  ;;  %v827_v20 = vpack.c.b16 %v1431_v57, %v1398_v17  ;;  %v825_v52 = vpack.c.b8 %v824_v40, %v823_v12 }
  0xb7   :  { %v573_v37 = vsel %vm557_vm13, %v541_v61, %v466_v7  ;;  %v589_v49 = vsel %vm557_vm13, %v1119_v58, %v482_v3  ;;  %v605_v25 = vsel %vm557_vm13, 5, %v498_v42  ;;  %v802_v45 = vsel %vm770_vm9, 7, %v711_v6 }
  0xb8   :  { %vm664_vm14 = vcmp.lt.f32.partialorder %v648_v9, %v573_v37  ;;  %832 = vst [vmem:[%s1556_s3] sm:$0xff] %v822_v39  ;;  %v828_v31 = vpack.c.b8 %v827_v20, %v826_v38  ;;  %v829_v58 = vpack.c.b16 %v1496_v36, %v1464_v59 }
  0xb9   :  { %v680_v5 = vsel %vm664_vm14, %v648_v9, %v573_v37  ;;  %v696_v63 = vsel %vm664_vm14, %v1122_v60, %v589_v49  ;;  %v712_v46 = vsel %vm664_vm14, 6, %v605_v25  ;;  %833 = vst [vmem:[%s1556_s3 + $0x8] sm:$0xff] %v825_v52 }
  0xba   :  { %vm771_vm15 = vcmp.lt.f32.partialorder %v755_v47, %v680_v5  ;;  %834 = vst [vmem:[%s1556_s3 + $0x10] sm:$0xff] %v828_v31 }
  0xbb   :  { %v787_v17 = vsel %vm771_vm15, %v1125_v62, %v696_v63  ;;  %v803_v57 = vsel %vm771_vm15, 7, %v712_v46 }
  0xbc   :  { %819 = vst [vmem:[%s1555_s2 + $0x78] sm:$0xff] %v787_v17  ;;  %v830_v60 = vpack.c.b16 %v803_v57, %v802_v45 }
  0xbe   :  { %v831_v8 = vpack.c.b8 %v830_v60, %v829_v58 }
  0xc0   :  { %835 = vst [vmem:[%s1556_s3 + $0x18] sm:$0xff] %v831_v8 }

</bundles_post_ra>
